<compile_context>
chip_gen: v7x
topology: tpu7x:2x2x1
jax: 0.10.0
libtpu: 0.0.40
codegen_flags: <defaults>
</compile_context>

<pallas_src>
import jax
import jax.numpy as jnp
from jax.experimental import pallas as pl
from jax.experimental.pallas import tpu as pltpu


# --------------------- kernel 1: GRU + attention + b(c_t) -------------------- #
def gru_attn_kernel(embs_ref, len_ref, amask_ref,
                    wir_ref, wiz_ref, win_ref,
                    bir_ref, biz_ref, bin_ref,
                    whr_ref, whz_ref, whn_ref,
                    bhr_ref, bhz_ref, bhn_ref,
                    a1t_ref, a2t_ref, vt_ref, bwt_ref,
                    ct_ref, proj_ref,
                    xr_scr, xz_scr, xn_scr, go_scr, q1_scr):
    TB, H = go_scr.shape
    Bp = ct_ref.shape[0]
    T = TB // Bp

    # ---- hoisted per-gate input projections (bias folded in) -----------------
    # Per-gate layout keeps every per-step read a clean (Bp, H) sublane slice
    # (no mid-vreg lane slicing of a fused (B, 3H) result).
    embs = embs_ref[...]                                                 # (T*Bp, E)
    xr_scr[...] = jnp.dot(embs, wir_ref[...],
                          preferred_element_type=jnp.float32) + bir_ref[...]
    xz_scr[...] = jnp.dot(embs, wiz_ref[...],
                          preferred_element_type=jnp.float32) + biz_ref[...]
    xn_scr[...] = jnp.dot(embs, win_ref[...],
                          preferred_element_type=jnp.float32) + bin_ref[...]

    whr = whr_ref[...]; whz = whz_ref[...]; whn = whn_ref[...]
    bhr = bhr_ref[...]; bhz = bhz_ref[...]; bhn = bhn_ref[...]
    lens = len_ref[...]                                                  # (Bp, 1) i32

    def gru_step(t, h):
        idx = pl.multiple_of(t * Bp, Bp)
        gh_r = jnp.dot(h, whr, preferred_element_type=jnp.float32) + bhr
        gh_z = jnp.dot(h, whz, preferred_element_type=jnp.float32) + bhz
        gh_n = jnp.dot(h, whn, preferred_element_type=jnp.float32) + bhn
        r = jax.nn.sigmoid(xr_scr[pl.ds(idx, Bp), :] + gh_r)
        z = jax.nn.sigmoid(xz_scr[pl.ds(idx, Bp), :] + gh_z)
        n = jnp.tanh(xn_scr[pl.ds(idx, Bp), :] + r * gh_n)
        h_new = (1.0 - z) * n + z * h
        m = (t < lens).astype(jnp.float32)                # (Bp, 1) packed-seq mask
        go_scr[pl.ds(idx, Bp), :] = m * h_new             # pad_packed zero-pads out
        return m * h_new + (1.0 - m) * h                  # freeze h once t >= len[b]

    ht = jax.lax.fori_loop(0, T, gru_step, jnp.zeros((Bp, H), jnp.float32),
                           unroll=min(T, 8))              # cap unroll for large T

    # ---- attention -------------------------------------------------------------
    # Hoisted q1 = a_1(gru_out) as one bulk matmul over all timesteps.
    q1_scr[...] = jnp.dot(go_scr[...], a1t_ref[...],
                          preferred_element_type=jnp.float32)
    q2 = jnp.dot(ht, a2t_ref[...], preferred_element_type=jnp.float32)   # (Bp, H)
    vt = vt_ref[...]                                                     # (1, H)

    def attn_step(t, c_acc):
        idx = pl.multiple_of(t * Bp, Bp)
        g_t = go_scr[pl.ds(idx, Bp), :]                                  # (Bp, H)
        am = amask_ref[pl.ds(idx, Bp), :]                                # (Bp, 1)
        sig = jax.nn.sigmoid(q1_scr[pl.ds(idx, Bp), :] + am * q2)
        # v_t: VPU multiply + lane reduction instead of an N=1 MXU matmul.
        alpha = jnp.sum(sig * vt, axis=-1, keepdims=True)                # (Bp, 1)
        return c_acc + alpha * g_t

    c_local = jax.lax.fori_loop(0, T, attn_step, jnp.zeros((Bp, H), jnp.float32),
                                unroll=min(T, 8))

    c_t = jnp.concatenate([c_local, ht], axis=1)                         # (Bp, 2H)
    ct_ref[...] = c_t
    # ct_dropout: eval mode -> identity
    # TODO(synk): training-mode dropout (emb_dropout / ct_dropout) not implemented.
    proj = jnp.dot(c_t, bwt_ref[...], preferred_element_type=jnp.float32)  # (Bp, E)
    proj_ref[...] = proj.astype(proj_ref.dtype)


# ----------------------- kernel 2: item-score table scan --------------------- #
def score_kernel(proj_ref, items_ref, scores_ref):
    # (Bp, E) x (TN, E)^T — natural table layout, f32 accumulation on the MXU.
    scores_ref[...] = jax.lax.dot_general(
        proj_ref[...], items_ref[...],
        dimension_numbers=(((1,), (1,)), ((), ())),
        preferred_element_type=jnp.float32)


# ------------------------------ host wrapper --------------------------------- #
def _round_up(x, m):
    return (x + m - 1) // m * m


def _full(shape):
    nd = len(shape)
    return pl.BlockSpec(shape, lambda i, nd=nd: (0,) * nd)


def narm_forward(seq, lengths, params, emb_table):
    T, B = seq.shape
    n_items, E = emb_table.shape
    H = params["wh_r"].shape[0]

    # Pad batch to a multiple of 8 sublanes (padded sessions: length 0, all-zero).
    Bp = _round_up(B, 8)
    seq_p = jnp.zeros((T, Bp), jnp.int32).at[:, :B].set(seq.astype(jnp.int32))
    len_p = jnp.zeros((Bp, 1), jnp.int32).at[:B, 0].set(lengths.astype(jnp.int32))

    # Embedding gather (emb_dropout = identity); pre-flattened time-major so the
    # kernel never reshapes a non-sublane-aligned (T, B) pair.
    embs_flat = jnp.take(emb_table, seq_p, axis=0).astype(jnp.float32).reshape(T * Bp, E)
    amask_flat = (seq_p.reshape(T * Bp, 1) > 0).astype(jnp.float32)     # (seq > 0) mask

    # ---------------- call 1: GRU + attention + b-projection ------------------
    c_t_p, proj = pl.pallas_call(
        gru_attn_kernel,
        grid=(1,),
        in_specs=[
            _full((T * Bp, E)),                       # embedded sequence (flat)
            _full((Bp, 1)),                           # lengths column
            _full((T * Bp, 1)),                       # attention mask (seq > 0)
            _full((E, H)), _full((E, H)), _full((E, H)),    # W_i{r,z,n}
            _full((1, H)), _full((1, H)), _full((1, H)),    # b_i{r,z,n}
            _full((H, H)), _full((H, H)), _full((H, H)),    # W_h{r,z,n}
            _full((1, H)), _full((1, H)), _full((1, H)),    # b_h{r,z,n}
            _full((H, H)), _full((H, H)),                   # a_1, a_2 (pre-transposed)
            _full((1, H)),                                  # v_t weight row
            _full((2 * H, E)),                              # b (pre-transposed)
        ],
        out_specs=[
            pl.BlockSpec((Bp, 2 * H), lambda i: (0, 0)),    # c_t
            pl.BlockSpec((Bp, E), lambda i: (0, 0)),        # proj = b(c_t), bf16
        ],
        out_shape=(jax.ShapeDtypeStruct((Bp, 2 * H), jnp.float32),
                   jax.ShapeDtypeStruct((Bp, E), jnp.bfloat16)),
        scratch_shapes=[pltpu.VMEM((T * Bp, H), jnp.float32)] * 5,   # xr, xz, xn, go, q1
        compiler_params=pltpu.CompilerParams(
            dimension_semantics=("arbitrary",),
            vmem_limit_bytes=32 * 1024 * 1024),
    )(embs_flat, len_p, amask_flat,
      params["wi_r"], params["wi_z"], params["wi_n"],
      params["bi_r"], params["bi_z"], params["bi_n"],
      params["wh_r"], params["wh_z"], params["wh_n"],
      params["bh_r"], params["bh_z"], params["bh_n"],
      params["a1t"], params["a2t"], params["vt"], params["bwt"])

    # ---------------- call 2: item-score scan (parallel over item tiles) ------
    TN = min(4096, _round_up(n_items, 128))          # big lane-dense tiles
    Np = _round_up(n_items, TN)                      # pad table: keeps pipeline alive
    # bf16 table halves the dominant HBM bytes (score phase is HBM-bound); in a
    # serving setup this copy would be precomputed once.
    items_bf16 = jnp.zeros((Np, E), jnp.bfloat16).at[:n_items].set(
        emb_table.astype(jnp.bfloat16))

    scores_p = pl.pallas_call(
        score_kernel,
        grid=(Np // TN,),
        in_specs=[
            pl.BlockSpec((Bp, E), lambda j: (0, 0)),          # proj (resident)
            pl.BlockSpec((TN, E), lambda j: (j, 0)),          # item tile (bf16)
        ],
        out_specs=pl.BlockSpec((Bp, TN), lambda j: (0, j)),   # lane-dense scores tile
        out_shape=jax.ShapeDtypeStruct((Bp, Np), jnp.float32),
        compiler_params=pltpu.CompilerParams(
            dimension_semantics=("parallel",),                # megacore-friendly on v7x
            vmem_limit_bytes=32 * 1024 * 1024),
        cost_estimate=pl.CostEstimate(
            flops=2 * Bp * E * Np,
            transcendentals=0,
            bytes_accessed=Np * E * 2 + Bp * E * 2 + Bp * Np * 4),
    )(proj, items_bf16)

    return scores_p[:B, :n_items], c_t_p[:B]


# ---------------------------------- main ------------------------------------- #
if __name__ == "__main__":
    n_items, hidden_size, embedding_dim = 64, 32, 32
    B, T = 4, 8
    H, E = hidden_size, embedding_dim

    key = jax.random.PRNGKey(0)
    ks = jax.random.split(key, 20)
    s = 0.1

    def rnd(k, shape):
        return jax.random.normal(k, shape, jnp.float32) * s

    emb_table = rnd(ks[0], (n_items, E)).at[0].set(0.0)            # padding_idx=0

    # GRU weights stored per-gate, pre-transposed to (in, out).
    params = dict(
        wi_r=rnd(ks[1], (E, H)), wi_z=rnd(ks[2], (E, H)), wi_n=rnd(ks[3], (E, H)),
        wh_r=rnd(ks[4], (H, H)), wh_z=rnd(ks[5], (H, H)), wh_n=rnd(ks[6], (H, H)),
        bi_r=rnd(ks[7], (1, H)), bi_z=rnd(ks[8], (1, H)), bi_n=rnd(ks[9], (1, H)),
        bh_r=rnd(ks[10], (1, H)), bh_z=rnd(ks[11], (1, H)), bh_n=rnd(ks[12], (1, H)),
        a1t=rnd(ks[13], (H, H)),                  # a_1 weight, pre-transposed
        a2t=rnd(ks[14], (H, H)),                  # a_2 weight, pre-transposed
        vt=rnd(ks[15], (1, H)),                   # v_t weight row (Linear(H, 1))
        bwt=rnd(ks[16], (2 * H, E)),              # b weight, pre-transposed
    )

    # lengths sorted descending (pack_padded_sequence enforce_sorted=True)
    lengths = jnp.array([8, 6, 5, 3], dtype=jnp.int32)
    seq_ids = jax.random.randint(ks[17], (T, B), 1, n_items, dtype=jnp.int32)
    valid = jnp.arange(T)[:, None] < lengths[None, :]
    seq = jnp.where(valid, seq_ids, 0).astype(jnp.int32)           # (T, B), zero-padded

    scores, c_t = narm_forward(seq, lengths, params, emb_table)
    jax.block_until_ready((scores, c_t))

    # -------- pure-JAX f32 reference for validation --------
    def ref_forward(seq, lengths, p, table):
        Tt, Bb = seq.shape
        embs = jnp.take(table, seq, axis=0)                        # (T, B, E)

        def step(h, t):
            x = embs[t]
            r = jax.nn.sigmoid(x @ p["wi_r"] + p["bi_r"] + h @ p["wh_r"] + p["bh_r"])
            z = jax.nn.sigmoid(x @ p["wi_z"] + p["bi_z"] + h @ p["wh_z"] + p["bh_z"])
            n = jnp.tanh(x @ p["wi_n"] + p["bi_n"] + r * (h @ p["wh_n"] + p["bh_n"]))
            h_new = (1.0 - z) * n + z * h
            m = (t < lengths)[:, None].astype(jnp.float32)
            return m * h_new + (1.0 - m) * h, m * h_new

        ht, gru_out = jax.lax.scan(step, jnp.zeros((Bb, H), jnp.float32),
                                   jnp.arange(Tt))
        q1 = jnp.einsum("tbh,hk->tbk", gru_out, p["a1t"])
        q2 = ht @ p["a2t"]
        mask = (seq > 0).astype(jnp.float32)[:, :, None]
        sig = jax.nn.sigmoid(q1 + mask * q2[None])
        alpha = jnp.sum(sig * p["vt"][None], axis=-1, keepdims=True)
        c_local = jnp.sum(alpha * gru_out, axis=0)
        ct = jnp.concatenate([c_local, ht], axis=1)
        return (ct @ p["bwt"]) @ table.T, ct

    ref_scores, ref_ct = ref_forward(seq, lengths, params, emb_table)

    assert scores.shape == (B, n_items) and c_t.shape == (B, 2 * H)
    assert bool(jnp.all(jnp.isfinite(scores))) and bool(jnp.all(jnp.isfinite(c_t)))
    assert bool(jnp.allclose(c_t, ref_ct, atol=2e-3, rtol=2e-3))
    assert bool(jnp.allclose(scores, ref_scores, atol=5e-2, rtol=5e-2))  # bf16 table
    print("KERNEL_OK")
</pallas_src>

<mosaic_0001>
module attributes {stable_mosaic.version = 11 : i64} {
  func.func @gru_attn_kernel(%arg0: i32, %arg1: memref<64x32xf32, #tpu.memory_space<vmem>>, %arg2: memref<8x1xi32, #tpu.memory_space<vmem>>, %arg3: memref<64x1xf32, #tpu.memory_space<vmem>>, %arg4: memref<32x32xf32, #tpu.memory_space<vmem>>, %arg5: memref<32x32xf32, #tpu.memory_space<vmem>>, %arg6: memref<32x32xf32, #tpu.memory_space<vmem>>, %arg7: memref<1x32xf32, #tpu.memory_space<vmem>>, %arg8: memref<1x32xf32, #tpu.memory_space<vmem>>, %arg9: memref<1x32xf32, #tpu.memory_space<vmem>>, %arg10: memref<32x32xf32, #tpu.memory_space<vmem>>, %arg11: memref<32x32xf32, #tpu.memory_space<vmem>>, %arg12: memref<32x32xf32, #tpu.memory_space<vmem>>, %arg13: memref<1x32xf32, #tpu.memory_space<vmem>>, %arg14: memref<1x32xf32, #tpu.memory_space<vmem>>, %arg15: memref<1x32xf32, #tpu.memory_space<vmem>>, %arg16: memref<32x32xf32, #tpu.memory_space<vmem>>, %arg17: memref<32x32xf32, #tpu.memory_space<vmem>>, %arg18: memref<1x32xf32, #tpu.memory_space<vmem>>, %arg19: memref<64x32xf32, #tpu.memory_space<vmem>>, %arg20: memref<8x64xf32, #tpu.memory_space<vmem>>, %arg21: memref<8x32xbf16, #tpu.memory_space<vmem>>, %arg22: memref<64x32xf32, #tpu.memory_space<vmem>>, %arg23: memref<64x32xf32, #tpu.memory_space<vmem>>, %arg24: memref<64x32xf32, #tpu.memory_space<vmem>>, %arg25: memref<64x32xf32, #tpu.memory_space<vmem>>, %arg26: memref<64x32xf32, #tpu.memory_space<vmem>>) attributes {dimension_semantics = [#tpu.dimension_semantics<arbitrary>], iteration_bounds = array<i64: 1>, scalar_prefetch = 0 : i64, scratch_operands = 5 : i64, tpu.core_type = #tpu.core_type<tc>, window_params = [{pipeline_mode = #tpu.pipeline_mode<synchronous>, transform_indices = @transform_0, window_bounds = array<i64: 64, 32>}, {pipeline_mode = #tpu.pipeline_mode<synchronous>, transform_indices = @transform_1, window_bounds = array<i64: 8, 1>}, {pipeline_mode = #tpu.pipeline_mode<synchronous>, transform_indices = @transform_2, window_bounds = array<i64: 64, 1>}, {pipeline_mode = #tpu.pipeline_mode<synchronous>, transform_indices = @transform_3, window_bounds = array<i64: 32, 32>}, {pipeline_mode = #tpu.pipeline_mode<synchronous>, transform_indices = @transform_4, window_bounds = array<i64: 32, 32>}, {pipeline_mode = #tpu.pipeline_mode<synchronous>, transform_indices = @transform_5, window_bounds = array<i64: 32, 32>}, {pipeline_mode = #tpu.pipeline_mode<synchronous>, transform_indices = @transform_6, window_bounds = array<i64: 1, 32>}, {pipeline_mode = #tpu.pipeline_mode<synchronous>, transform_indices = @transform_7, window_bounds = array<i64: 1, 32>}, {pipeline_mode = #tpu.pipeline_mode<synchronous>, transform_indices = @transform_8, window_bounds = array<i64: 1, 32>}, {pipeline_mode = #tpu.pipeline_mode<synchronous>, transform_indices = @transform_9, window_bounds = array<i64: 32, 32>}, {pipeline_mode = #tpu.pipeline_mode<synchronous>, transform_indices = @transform_10, window_bounds = array<i64: 32, 32>}, {pipeline_mode = #tpu.pipeline_mode<synchronous>, transform_indices = @transform_11, window_bounds = array<i64: 32, 32>}, {pipeline_mode = #tpu.pipeline_mode<synchronous>, transform_indices = @transform_12, window_bounds = array<i64: 1, 32>}, {pipeline_mode = #tpu.pipeline_mode<synchronous>, transform_indices = @transform_13, window_bounds = array<i64: 1, 32>}, {pipeline_mode = #tpu.pipeline_mode<synchronous>, transform_indices = @transform_14, window_bounds = array<i64: 1, 32>}, {pipeline_mode = #tpu.pipeline_mode<synchronous>, transform_indices = @transform_15, window_bounds = array<i64: 32, 32>}, {pipeline_mode = #tpu.pipeline_mode<synchronous>, transform_indices = @transform_16, window_bounds = array<i64: 32, 32>}, {pipeline_mode = #tpu.pipeline_mode<synchronous>, transform_indices = @transform_17, window_bounds = array<i64: 1, 32>}, {pipeline_mode = #tpu.pipeline_mode<synchronous>, transform_indices = @transform_18, window_bounds = array<i64: 64, 32>}, {pipeline_mode = #tpu.pipeline_mode<synchronous>, transform_indices = @transform_19, window_bounds = array<i64: 8, 64>}, {pipeline_mode = #tpu.pipeline_mode<synchronous>, transform_indices = @transform_20, window_bounds = array<i64: 8, 32>}]} {
    %c0 = arith.constant 0 : index
    %c0_0 = arith.constant 0 : index
    %0 = vector.load %arg1[%c0, %c0_0] : memref<64x32xf32, #tpu.memory_space<vmem>>, vector<64x32xf32>
    %c0_1 = arith.constant 0 : index
    %c0_2 = arith.constant 0 : index
    %1 = vector.load %arg4[%c0_1, %c0_2] : memref<32x32xf32, #tpu.memory_space<vmem>>, vector<32x32xf32>
    %cst = arith.constant dense<0.000000e+00> : vector<64x32xf32>
    %2 = tpu.matmul %0, %1, %cst {dimension_numbers = #tpu.dot_dimension_numbers<[1], [0], [0], [1], [0, 0, 1, 1], [], []>} : vector<64x32xf32>, vector<32x32xf32>, vector<64x32xf32> -> vector<64x32xf32>
    %c0_3 = arith.constant 0 : index
    %c0_4 = arith.constant 0 : index
    %3 = vector.load %arg7[%c0_3, %c0_4] : memref<1x32xf32, #tpu.memory_space<vmem>>, vector<1x32xf32>
    %4 = vector.broadcast %3 : vector<1x32xf32> to vector<64x32xf32>
    %5 = arith.addf %2, %4 : vector<64x32xf32>
    %c0_5 = arith.constant 0 : index
    %c0_6 = arith.constant 0 : index
    %6 = vector.load %arg22[%c0_5, %c0_6] : memref<64x32xf32, #tpu.memory_space<vmem>>, vector<64x32xf32>
    tpu.vector_store %arg22[%c0_5, %c0_6], %5 {strides = array<i32>} : memref<64x32xf32, #tpu.memory_space<vmem>>, vector<64x32xf32>,
    %c0_7 = arith.constant 0 : index
    %c0_8 = arith.constant 0 : index
    %7 = vector.load %arg5[%c0_7, %c0_8] : memref<32x32xf32, #tpu.memory_space<vmem>>, vector<32x32xf32>
    %cst_9 = arith.constant dense<0.000000e+00> : vector<64x32xf32>
    %8 = tpu.matmul %0, %7, %cst_9 {dimension_numbers = #tpu.dot_dimension_numbers<[1], [0], [0], [1], [0, 0, 1, 1], [], []>} : vector<64x32xf32>, vector<32x32xf32>, vector<64x32xf32> -> vector<64x32xf32>
    %c0_10 = arith.constant 0 : index
    %c0_11 = arith.constant 0 : index
    %9 = vector.load %arg8[%c0_10, %c0_11] : memref<1x32xf32, #tpu.memory_space<vmem>>, vector<1x32xf32>
    %10 = vector.broadcast %9 : vector<1x32xf32> to vector<64x32xf32>
    %11 = arith.addf %8, %10 : vector<64x32xf32>
    %c0_12 = arith.constant 0 : index
    %c0_13 = arith.constant 0 : index
    %12 = vector.load %arg23[%c0_12, %c0_13] : memref<64x32xf32, #tpu.memory_space<vmem>>, vector<64x32xf32>
    tpu.vector_store %arg23[%c0_12, %c0_13], %11 {strides = array<i32>} : memref<64x32xf32, #tpu.memory_space<vmem>>, vector<64x32xf32>,
    %c0_14 = arith.constant 0 : index
    %c0_15 = arith.constant 0 : index
    %13 = vector.load %arg6[%c0_14, %c0_15] : memref<32x32xf32, #tpu.memory_space<vmem>>, vector<32x32xf32>
    %cst_16 = arith.constant dense<0.000000e+00> : vector<64x32xf32>
    %14 = tpu.matmul %0, %13, %cst_16 {dimension_numbers = #tpu.dot_dimension_numbers<[1], [0], [0], [1], [0, 0, 1, 1], [], []>} : vector<64x32xf32>, vector<32x32xf32>, vector<64x32xf32> -> vector<64x32xf32>
    %c0_17 = arith.constant 0 : index
    %c0_18 = arith.constant 0 : index
    %15 = vector.load %arg9[%c0_17, %c0_18] : memref<1x32xf32, #tpu.memory_space<vmem>>, vector<1x32xf32>
    %16 = vector.broadcast %15 : vector<1x32xf32> to vector<64x32xf32>
    %17 = arith.addf %14, %16 : vector<64x32xf32>
    %c0_19 = arith.constant 0 : index
    %c0_20 = arith.constant 0 : index
    %18 = vector.load %arg24[%c0_19, %c0_20] : memref<64x32xf32, #tpu.memory_space<vmem>>, vector<64x32xf32>
    tpu.vector_store %arg24[%c0_19, %c0_20], %17 {strides = array<i32>} : memref<64x32xf32, #tpu.memory_space<vmem>>, vector<64x32xf32>,
    %c0_21 = arith.constant 0 : index
    %c0_22 = arith.constant 0 : index
    %19 = vector.load %arg10[%c0_21, %c0_22] : memref<32x32xf32, #tpu.memory_space<vmem>>, vector<32x32xf32>
    %c0_23 = arith.constant 0 : index
    %c0_24 = arith.constant 0 : index
    %20 = vector.load %arg11[%c0_23, %c0_24] : memref<32x32xf32, #tpu.memory_space<vmem>>, vector<32x32xf32>
    %c0_25 = arith.constant 0 : index
    %c0_26 = arith.constant 0 : index
    %21 = vector.load %arg12[%c0_25, %c0_26] : memref<32x32xf32, #tpu.memory_space<vmem>>, vector<32x32xf32>
    %c0_27 = arith.constant 0 : index
    %c0_28 = arith.constant 0 : index
    %22 = vector.load %arg13[%c0_27, %c0_28] : memref<1x32xf32, #tpu.memory_space<vmem>>, vector<1x32xf32>
    %c0_29 = arith.constant 0 : index
    %c0_30 = arith.constant 0 : index
    %23 = vector.load %arg14[%c0_29, %c0_30] : memref<1x32xf32, #tpu.memory_space<vmem>>, vector<1x32xf32>
    %c0_31 = arith.constant 0 : index
    %c0_32 = arith.constant 0 : index
    %24 = vector.load %arg15[%c0_31, %c0_32] : memref<1x32xf32, #tpu.memory_space<vmem>>, vector<1x32xf32>
    %c0_33 = arith.constant 0 : index
    %c0_34 = arith.constant 0 : index
    %25 = vector.load %arg2[%c0_33, %c0_34] : memref<8x1xi32, #tpu.memory_space<vmem>>, vector<8x1xi32>
    %cst_35 = arith.constant 0.000000e+00 : f32
    %26 = vector.broadcast %cst_35 : f32 to vector<8x32xf32>
    %c0_i32 = arith.constant 0 : i32
    %c8_i32 = arith.constant 8 : i32
    %27 = arith.muli %c0_i32, %c8_i32 : i32
    %28 = tpu.assume_multiple %27, 8 : i32
    %cst_36 = arith.constant dense<0.000000e+00> : vector<8x32xf32>
    %29 = tpu.matmul %26, %19, %cst_36 {dimension_numbers = #tpu.dot_dimension_numbers<[1], [0], [0], [1], [0, 0, 1, 1], [], []>} : vector<8x32xf32>, vector<32x32xf32>, vector<8x32xf32> -> vector<8x32xf32>
    %30 = vector.broadcast %22 : vector<1x32xf32> to vector<8x32xf32>
    %31 = arith.addf %29, %30 : vector<8x32xf32>
    %cst_37 = arith.constant dense<0.000000e+00> : vector<8x32xf32>
    %32 = tpu.matmul %26, %20, %cst_37 {dimension_numbers = #tpu.dot_dimension_numbers<[1], [0], [0], [1], [0, 0, 1, 1], [], []>} : vector<8x32xf32>, vector<32x32xf32>, vector<8x32xf32> -> vector<8x32xf32>
    %33 = vector.broadcast %23 : vector<1x32xf32> to vector<8x32xf32>
    %34 = arith.addf %32, %33 : vector<8x32xf32>
    %cst_38 = arith.constant dense<0.000000e+00> : vector<8x32xf32>
    %35 = tpu.matmul %26, %21, %cst_38 {dimension_numbers = #tpu.dot_dimension_numbers<[1], [0], [0], [1], [0, 0, 1, 1], [], []>} : vector<8x32xf32>, vector<32x32xf32>, vector<8x32xf32> -> vector<8x32xf32>
    %36 = vector.broadcast %24 : vector<1x32xf32> to vector<8x32xf32>
    %37 = arith.addf %35, %36 : vector<8x32xf32>
    %38 = arith.index_cast %28 : i32 to index
    %c0_39 = arith.constant 0 : index
    %39 = vector.load %arg22[%38, %c0_39] : memref<64x32xf32, #tpu.memory_space<vmem>>, vector<8x32xf32>
    %40 = arith.addf %39, %31 : vector<8x32xf32>
    %41 = arith.negf %40 : vector<8x32xf32>
    %42 = math.exp %41 : vector<8x32xf32>
    %cst_40 = arith.constant 1.000000e+00 : f32
    %43 = vector.broadcast %cst_40 : f32 to vector<8x32xf32>
    %44 = arith.addf %43, %42 : vector<8x32xf32>
    %45 = arith.divf %43, %44 : vector<8x32xf32>
    %46 = arith.index_cast %28 : i32 to index
    %c0_41 = arith.constant 0 : index
    %47 = vector.load %arg23[%46, %c0_41] : memref<64x32xf32, #tpu.memory_space<vmem>>, vector<8x32xf32>
    %48 = arith.addf %47, %34 : vector<8x32xf32>
    %49 = arith.negf %48 : vector<8x32xf32>
    %50 = math.exp %49 : vector<8x32xf32>
    %cst_42 = arith.constant 1.000000e+00 : f32
    %51 = vector.broadcast %cst_42 : f32 to vector<8x32xf32>
    %52 = arith.addf %51, %50 : vector<8x32xf32>
    %53 = arith.divf %51, %52 : vector<8x32xf32>
    %54 = arith.index_cast %28 : i32 to index
    %c0_43 = arith.constant 0 : index
    %55 = vector.load %arg24[%54, %c0_43] : memref<64x32xf32, #tpu.memory_space<vmem>>, vector<8x32xf32>
    %56 = arith.mulf %45, %37 : vector<8x32xf32>
    %57 = arith.addf %55, %56 : vector<8x32xf32>
    %58 = math.tanh %57 : vector<8x32xf32>
    %cst_44 = arith.constant 1.000000e+00 : f32
    %59 = vector.broadcast %cst_44 : f32 to vector<8x32xf32>
    %60 = arith.subf %59, %53 : vector<8x32xf32>
    %61 = arith.mulf %60, %58 : vector<8x32xf32>
    %62 = arith.mulf %53, %26 : vector<8x32xf32>
    %63 = arith.addf %61, %62 : vector<8x32xf32>
    %64 = vector.broadcast %c0_i32 : i32 to vector<8x1xi32>
    %65 = arith.cmpi slt, %64, %25 : vector<8x1xi32>
    %66 = arith.extui %65 : vector<8x1xi1> to vector<8x1xi32>
    %67 = arith.sitofp %66 : vector<8x1xi32> to vector<8x1xf32>
    %68 = vector.broadcast %67 : vector<8x1xf32> to vector<8x32xf32>
    %69 = arith.mulf %68, %63 : vector<8x32xf32>
    %70 = arith.index_cast %28 : i32 to index
    %c0_45 = arith.constant 0 : index
    %71 = vector.load %arg25[%70, %c0_45] : memref<64x32xf32, #tpu.memory_space<vmem>>, vector<8x32xf32>
    tpu.vector_store %arg25[%70, %c0_45], %69 {strides = array<i32>} : memref<64x32xf32, #tpu.memory_space<vmem>>, vector<8x32xf32>,
    %72 = vector.broadcast %67 : vector<8x1xf32> to vector<8x32xf32>
    %73 = arith.mulf %72, %63 : vector<8x32xf32>
    %cst_46 = arith.constant 1.000000e+00 : f32
    %74 = vector.broadcast %cst_46 : f32 to vector<8x1xf32>
    %75 = arith.subf %74, %67 : vector<8x1xf32>
    %76 = vector.broadcast %75 : vector<8x1xf32> to vector<8x32xf32>
    %77 = arith.mulf %76, %26 : vector<8x32xf32>
    %78 = arith.addf %73, %77 : vector<8x32xf32>
    %c1_i32 = arith.constant 1 : i32
    %c8_i32_47 = arith.constant 8 : i32
    %79 = arith.muli %c1_i32, %c8_i32_47 : i32
    %80 = tpu.assume_multiple %79, 8 : i32
    %cst_48 = arith.constant dense<0.000000e+00> : vector<8x32xf32>
    %81 = tpu.matmul %78, %19, %cst_48 {dimension_numbers = #tpu.dot_dimension_numbers<[1], [0], [0], [1], [0, 0, 1, 1], [], []>} : vector<8x32xf32>, vector<32x32xf32>, vector<8x32xf32> -> vector<8x32xf32>
    %82 = vector.broadcast %22 : vector<1x32xf32> to vector<8x32xf32>
    %83 = arith.addf %81, %82 : vector<8x32xf32>
    %cst_49 = arith.constant dense<0.000000e+00> : vector<8x32xf32>
    %84 = tpu.matmul %78, %20, %cst_49 {dimension_numbers = #tpu.dot_dimension_numbers<[1], [0], [0], [1], [0, 0, 1, 1], [], []>} : vector<8x32xf32>, vector<32x32xf32>, vector<8x32xf32> -> vector<8x32xf32>
    %85 = vector.broadcast %23 : vector<1x32xf32> to vector<8x32xf32>
    %86 = arith.addf %84, %85 : vector<8x32xf32>
    %cst_50 = arith.constant dense<0.000000e+00> : vector<8x32xf32>
    %87 = tpu.matmul %78, %21, %cst_50 {dimension_numbers = #tpu.dot_dimension_numbers<[1], [0], [0], [1], [0, 0, 1, 1], [], []>} : vector<8x32xf32>, vector<32x32xf32>, vector<8x32xf32> -> vector<8x32xf32>
    %88 = vector.broadcast %24 : vector<1x32xf32> to vector<8x32xf32>
    %89 = arith.addf %87, %88 : vector<8x32xf32>
    %90 = arith.index_cast %80 : i32 to index
    %c0_51 = arith.constant 0 : index
    %91 = vector.load %arg22[%90, %c0_51] : memref<64x32xf32, #tpu.memory_space<vmem>>, vector<8x32xf32>
    %92 = arith.addf %91, %83 : vector<8x32xf32>
    %93 = arith.negf %92 : vector<8x32xf32>
    %94 = math.exp %93 : vector<8x32xf32>
    %cst_52 = arith.constant 1.000000e+00 : f32
    %95 = vector.broadcast %cst_52 : f32 to vector<8x32xf32>
    %96 = arith.addf %95, %94 : vector<8x32xf32>
    %97 = arith.divf %95, %96 : vector<8x32xf32>
    %98 = arith.index_cast %80 : i32 to index
    %c0_53 = arith.constant 0 : index
    %99 = vector.load %arg23[%98, %c0_53] : memref<64x32xf32, #tpu.memory_space<vmem>>, vector<8x32xf32>
    %100 = arith.addf %99, %86 : vector<8x32xf32>
    %101 = arith.negf %100 : vector<8x32xf32>
    %102 = math.exp %101 : vector<8x32xf32>
    %cst_54 = arith.constant 1.000000e+00 : f32
    %103 = vector.broadcast %cst_54 : f32 to vector<8x32xf32>
    %104 = arith.addf %103, %102 : vector<8x32xf32>
    %105 = arith.divf %103, %104 : vector<8x32xf32>
    %106 = arith.index_cast %80 : i32 to index
    %c0_55 = arith.constant 0 : index
    %107 = vector.load %arg24[%106, %c0_55] : memref<64x32xf32, #tpu.memory_space<vmem>>, vector<8x32xf32>
    %108 = arith.mulf %97, %89 : vector<8x32xf32>
    %109 = arith.addf %107, %108 : vector<8x32xf32>
    %110 = math.tanh %109 : vector<8x32xf32>
    %cst_56 = arith.constant 1.000000e+00 : f32
    %111 = vector.broadcast %cst_56 : f32 to vector<8x32xf32>
    %112 = arith.subf %111, %105 : vector<8x32xf32>
    %113 = arith.mulf %112, %110 : vector<8x32xf32>
    %114 = arith.mulf %105, %78 : vector<8x32xf32>
    %115 = arith.addf %113, %114 : vector<8x32xf32>
    %116 = vector.broadcast %c1_i32 : i32 to vector<8x1xi32>
    %117 = arith.cmpi slt, %116, %25 : vector<8x1xi32>
    %118 = arith.extui %117 : vector<8x1xi1> to vector<8x1xi32>
    %119 = arith.sitofp %118 : vector<8x1xi32> to vector<8x1xf32>
    %120 = vector.broadcast %119 : vector<8x1xf32> to vector<8x32xf32>
    %121 = arith.mulf %120, %115 : vector<8x32xf32>
    %122 = arith.index_cast %80 : i32 to index
    %c0_57 = arith.constant 0 : index
    %123 = vector.load %arg25[%122, %c0_57] : memref<64x32xf32, #tpu.memory_space<vmem>>, vector<8x32xf32>
    tpu.vector_store %arg25[%122, %c0_57], %121 {strides = array<i32>} : memref<64x32xf32, #tpu.memory_space<vmem>>, vector<8x32xf32>,
    %124 = vector.broadcast %119 : vector<8x1xf32> to vector<8x32xf32>
    %125 = arith.mulf %124, %115 : vector<8x32xf32>
    %cst_58 = arith.constant 1.000000e+00 : f32
    %126 = vector.broadcast %cst_58 : f32 to vector<8x1xf32>
    %127 = arith.subf %126, %119 : vector<8x1xf32>
    %128 = vector.broadcast %127 : vector<8x1xf32> to vector<8x32xf32>
    %129 = arith.mulf %128, %78 : vector<8x32xf32>
    %130 = arith.addf %125, %129 : vector<8x32xf32>
    %c2_i32 = arith.constant 2 : i32
    %c8_i32_59 = arith.constant 8 : i32
    %131 = arith.muli %c2_i32, %c8_i32_59 : i32
    %132 = tpu.assume_multiple %131, 8 : i32
    %cst_60 = arith.constant dense<0.000000e+00> : vector<8x32xf32>
    %133 = tpu.matmul %130, %19, %cst_60 {dimension_numbers = #tpu.dot_dimension_numbers<[1], [0], [0], [1], [0, 0, 1, 1], [], []>} : vector<8x32xf32>, vector<32x32xf32>, vector<8x32xf32> -> vector<8x32xf32>
    %134 = vector.broadcast %22 : vector<1x32xf32> to vector<8x32xf32>
    %135 = arith.addf %133, %134 : vector<8x32xf32>
    %cst_61 = arith.constant dense<0.000000e+00> : vector<8x32xf32>
    %136 = tpu.matmul %130, %20, %cst_61 {dimension_numbers = #tpu.dot_dimension_numbers<[1], [0], [0], [1], [0, 0, 1, 1], [], []>} : vector<8x32xf32>, vector<32x32xf32>, vector<8x32xf32> -> vector<8x32xf32>
    %137 = vector.broadcast %23 : vector<1x32xf32> to vector<8x32xf32>
    %138 = arith.addf %136, %137 : vector<8x32xf32>
    %cst_62 = arith.constant dense<0.000000e+00> : vector<8x32xf32>
    %139 = tpu.matmul %130, %21, %cst_62 {dimension_numbers = #tpu.dot_dimension_numbers<[1], [0], [0], [1], [0, 0, 1, 1], [], []>} : vector<8x32xf32>, vector<32x32xf32>, vector<8x32xf32> -> vector<8x32xf32>
    %140 = vector.broadcast %24 : vector<1x32xf32> to vector<8x32xf32>
    %141 = arith.addf %139, %140 : vector<8x32xf32>
    %142 = arith.index_cast %132 : i32 to index
    %c0_63 = arith.constant 0 : index
    %143 = vector.load %arg22[%142, %c0_63] : memref<64x32xf32, #tpu.memory_space<vmem>>, vector<8x32xf32>
    %144 = arith.addf %143, %135 : vector<8x32xf32>
    %145 = arith.negf %144 : vector<8x32xf32>
    %146 = math.exp %145 : vector<8x32xf32>
    %cst_64 = arith.constant 1.000000e+00 : f32
    %147 = vector.broadcast %cst_64 : f32 to vector<8x32xf32>
    %148 = arith.addf %147, %146 : vector<8x32xf32>
    %149 = arith.divf %147, %148 : vector<8x32xf32>
    %150 = arith.index_cast %132 : i32 to index
    %c0_65 = arith.constant 0 : index
    %151 = vector.load %arg23[%150, %c0_65] : memref<64x32xf32, #tpu.memory_space<vmem>>, vector<8x32xf32>
    %152 = arith.addf %151, %138 : vector<8x32xf32>
    %153 = arith.negf %152 : vector<8x32xf32>
    %154 = math.exp %153 : vector<8x32xf32>
    %cst_66 = arith.constant 1.000000e+00 : f32
    %155 = vector.broadcast %cst_66 : f32 to vector<8x32xf32>
    %156 = arith.addf %155, %154 : vector<8x32xf32>
    %157 = arith.divf %155, %156 : vector<8x32xf32>
    %158 = arith.index_cast %132 : i32 to index
    %c0_67 = arith.constant 0 : index
    %159 = vector.load %arg24[%158, %c0_67] : memref<64x32xf32, #tpu.memory_space<vmem>>, vector<8x32xf32>
    %160 = arith.mulf %149, %141 : vector<8x32xf32>
    %161 = arith.addf %159, %160 : vector<8x32xf32>
    %162 = math.tanh %161 : vector<8x32xf32>
    %cst_68 = arith.constant 1.000000e+00 : f32
    %163 = vector.broadcast %cst_68 : f32 to vector<8x32xf32>
    %164 = arith.subf %163, %157 : vector<8x32xf32>
    %165 = arith.mulf %164, %162 : vector<8x32xf32>
    %166 = arith.mulf %157, %130 : vector<8x32xf32>
    %167 = arith.addf %165, %166 : vector<8x32xf32>
    %168 = vector.broadcast %c2_i32 : i32 to vector<8x1xi32>
    %169 = arith.cmpi slt, %168, %25 : vector<8x1xi32>
    %170 = arith.extui %169 : vector<8x1xi1> to vector<8x1xi32>
    %171 = arith.sitofp %170 : vector<8x1xi32> to vector<8x1xf32>
    %172 = vector.broadcast %171 : vector<8x1xf32> to vector<8x32xf32>
    %173 = arith.mulf %172, %167 : vector<8x32xf32>
    %174 = arith.index_cast %132 : i32 to index
    %c0_69 = arith.constant 0 : index
    %175 = vector.load %arg25[%174, %c0_69] : memref<64x32xf32, #tpu.memory_space<vmem>>, vector<8x32xf32>
    tpu.vector_store %arg25[%174, %c0_69], %173 {strides = array<i32>} : memref<64x32xf32, #tpu.memory_space<vmem>>, vector<8x32xf32>,
    %176 = vector.broadcast %171 : vector<8x1xf32> to vector<8x32xf32>
    %177 = arith.mulf %176, %167 : vector<8x32xf32>
    %cst_70 = arith.constant 1.000000e+00 : f32
    %178 = vector.broadcast %cst_70 : f32 to vector<8x1xf32>
    %179 = arith.subf %178, %171 : vector<8x1xf32>
    %180 = vector.broadcast %179 : vector<8x1xf32> to vector<8x32xf32>
    %181 = arith.mulf %180, %130 : vector<8x32xf32>
    %182 = arith.addf %177, %181 : vector<8x32xf32>
    %c3_i32 = arith.constant 3 : i32
    %c8_i32_71 = arith.constant 8 : i32
    %183 = arith.muli %c3_i32, %c8_i32_71 : i32
    %184 = tpu.assume_multiple %183, 8 : i32
    %cst_72 = arith.constant dense<0.000000e+00> : vector<8x32xf32>
    %185 = tpu.matmul %182, %19, %cst_72 {dimension_numbers = #tpu.dot_dimension_numbers<[1], [0], [0], [1], [0, 0, 1, 1], [], []>} : vector<8x32xf32>, vector<32x32xf32>, vector<8x32xf32> -> vector<8x32xf32>
    %186 = vector.broadcast %22 : vector<1x32xf32> to vector<8x32xf32>
    %187 = arith.addf %185, %186 : vector<8x32xf32>
    %cst_73 = arith.constant dense<0.000000e+00> : vector<8x32xf32>
    %188 = tpu.matmul %182, %20, %cst_73 {dimension_numbers = #tpu.dot_dimension_numbers<[1], [0], [0], [1], [0, 0, 1, 1], [], []>} : vector<8x32xf32>, vector<32x32xf32>, vector<8x32xf32> -> vector<8x32xf32>
    %189 = vector.broadcast %23 : vector<1x32xf32> to vector<8x32xf32>
    %190 = arith.addf %188, %189 : vector<8x32xf32>
    %cst_74 = arith.constant dense<0.000000e+00> : vector<8x32xf32>
    %191 = tpu.matmul %182, %21, %cst_74 {dimension_numbers = #tpu.dot_dimension_numbers<[1], [0], [0], [1], [0, 0, 1, 1], [], []>} : vector<8x32xf32>, vector<32x32xf32>, vector<8x32xf32> -> vector<8x32xf32>
    %192 = vector.broadcast %24 : vector<1x32xf32> to vector<8x32xf32>
    %193 = arith.addf %191, %192 : vector<8x32xf32>
    %194 = arith.index_cast %184 : i32 to index
    %c0_75 = arith.constant 0 : index
    %195 = vector.load %arg22[%194, %c0_75] : memref<64x32xf32, #tpu.memory_space<vmem>>, vector<8x32xf32>
    %196 = arith.addf %195, %187 : vector<8x32xf32>
    %197 = arith.negf %196 : vector<8x32xf32>
    %198 = math.exp %197 : vector<8x32xf32>
    %cst_76 = arith.constant 1.000000e+00 : f32
    %199 = vector.broadcast %cst_76 : f32 to vector<8x32xf32>
    %200 = arith.addf %199, %198 : vector<8x32xf32>
    %201 = arith.divf %199, %200 : vector<8x32xf32>
    %202 = arith.index_cast %184 : i32 to index
    %c0_77 = arith.constant 0 : index
    %203 = vector.load %arg23[%202, %c0_77] : memref<64x32xf32, #tpu.memory_space<vmem>>, vector<8x32xf32>
    %204 = arith.addf %203, %190 : vector<8x32xf32>
    %205 = arith.negf %204 : vector<8x32xf32>
    %206 = math.exp %205 : vector<8x32xf32>
    %cst_78 = arith.constant 1.000000e+00 : f32
    %207 = vector.broadcast %cst_78 : f32 to vector<8x32xf32>
    %208 = arith.addf %207, %206 : vector<8x32xf32>
    %209 = arith.divf %207, %208 : vector<8x32xf32>
    %210 = arith.index_cast %184 : i32 to index
    %c0_79 = arith.constant 0 : index
    %211 = vector.load %arg24[%210, %c0_79] : memref<64x32xf32, #tpu.memory_space<vmem>>, vector<8x32xf32>
    %212 = arith.mulf %201, %193 : vector<8x32xf32>
    %213 = arith.addf %211, %212 : vector<8x32xf32>
    %214 = math.tanh %213 : vector<8x32xf32>
    %cst_80 = arith.constant 1.000000e+00 : f32
    %215 = vector.broadcast %cst_80 : f32 to vector<8x32xf32>
    %216 = arith.subf %215, %209 : vector<8x32xf32>
    %217 = arith.mulf %216, %214 : vector<8x32xf32>
    %218 = arith.mulf %209, %182 : vector<8x32xf32>
    %219 = arith.addf %217, %218 : vector<8x32xf32>
    %220 = vector.broadcast %c3_i32 : i32 to vector<8x1xi32>
    %221 = arith.cmpi slt, %220, %25 : vector<8x1xi32>
    %222 = arith.extui %221 : vector<8x1xi1> to vector<8x1xi32>
    %223 = arith.sitofp %222 : vector<8x1xi32> to vector<8x1xf32>
    %224 = vector.broadcast %223 : vector<8x1xf32> to vector<8x32xf32>
    %225 = arith.mulf %224, %219 : vector<8x32xf32>
    %226 = arith.index_cast %184 : i32 to index
    %c0_81 = arith.constant 0 : index
    %227 = vector.load %arg25[%226, %c0_81] : memref<64x32xf32, #tpu.memory_space<vmem>>, vector<8x32xf32>
    tpu.vector_store %arg25[%226, %c0_81], %225 {strides = array<i32>} : memref<64x32xf32, #tpu.memory_space<vmem>>, vector<8x32xf32>,
    %228 = vector.broadcast %223 : vector<8x1xf32> to vector<8x32xf32>
    %229 = arith.mulf %228, %219 : vector<8x32xf32>
    %cst_82 = arith.constant 1.000000e+00 : f32
    %230 = vector.broadcast %cst_82 : f32 to vector<8x1xf32>
    %231 = arith.subf %230, %223 : vector<8x1xf32>
    %232 = vector.broadcast %231 : vector<8x1xf32> to vector<8x32xf32>
    %233 = arith.mulf %232, %182 : vector<8x32xf32>
    %234 = arith.addf %229, %233 : vector<8x32xf32>
    %c4_i32 = arith.constant 4 : i32
    %c8_i32_83 = arith.constant 8 : i32
    %235 = arith.muli %c4_i32, %c8_i32_83 : i32
    %236 = tpu.assume_multiple %235, 8 : i32
    %cst_84 = arith.constant dense<0.000000e+00> : vector<8x32xf32>
    %237 = tpu.matmul %234, %19, %cst_84 {dimension_numbers = #tpu.dot_dimension_numbers<[1], [0], [0], [1], [0, 0, 1, 1], [], []>} : vector<8x32xf32>, vector<32x32xf32>, vector<8x32xf32> -> vector<8x32xf32>
    %238 = vector.broadcast %22 : vector<1x32xf32> to vector<8x32xf32>
    %239 = arith.addf %237, %238 : vector<8x32xf32>
    %cst_85 = arith.constant dense<0.000000e+00> : vector<8x32xf32>
    %240 = tpu.matmul %234, %20, %cst_85 {dimension_numbers = #tpu.dot_dimension_numbers<[1], [0], [0], [1], [0, 0, 1, 1], [], []>} : vector<8x32xf32>, vector<32x32xf32>, vector<8x32xf32> -> vector<8x32xf32>
    %241 = vector.broadcast %23 : vector<1x32xf32> to vector<8x32xf32>
    %242 = arith.addf %240, %241 : vector<8x32xf32>
    %cst_86 = arith.constant dense<0.000000e+00> : vector<8x32xf32>
    %243 = tpu.matmul %234, %21, %cst_86 {dimension_numbers = #tpu.dot_dimension_numbers<[1], [0], [0], [1], [0, 0, 1, 1], [], []>} : vector<8x32xf32>, vector<32x32xf32>, vector<8x32xf32> -> vector<8x32xf32>
    %244 = vector.broadcast %24 : vector<1x32xf32> to vector<8x32xf32>
    %245 = arith.addf %243, %244 : vector<8x32xf32>
    %246 = arith.index_cast %236 : i32 to index
    %c0_87 = arith.constant 0 : index
    %247 = vector.load %arg22[%246, %c0_87] : memref<64x32xf32, #tpu.memory_space<vmem>>, vector<8x32xf32>
    %248 = arith.addf %247, %239 : vector<8x32xf32>
    %249 = arith.negf %248 : vector<8x32xf32>
    %250 = math.exp %249 : vector<8x32xf32>
    %cst_88 = arith.constant 1.000000e+00 : f32
    %251 = vector.broadcast %cst_88 : f32 to vector<8x32xf32>
    %252 = arith.addf %251, %250 : vector<8x32xf32>
    %253 = arith.divf %251, %252 : vector<8x32xf32>
    %254 = arith.index_cast %236 : i32 to index
    %c0_89 = arith.constant 0 : index
    %255 = vector.load %arg23[%254, %c0_89] : memref<64x32xf32, #tpu.memory_space<vmem>>, vector<8x32xf32>
    %256 = arith.addf %255, %242 : vector<8x32xf32>
    %257 = arith.negf %256 : vector<8x32xf32>
    %258 = math.exp %257 : vector<8x32xf32>
    %cst_90 = arith.constant 1.000000e+00 : f32
    %259 = vector.broadcast %cst_90 : f32 to vector<8x32xf32>
    %260 = arith.addf %259, %258 : vector<8x32xf32>
    %261 = arith.divf %259, %260 : vector<8x32xf32>
    %262 = arith.index_cast %236 : i32 to index
    %c0_91 = arith.constant 0 : index
    %263 = vector.load %arg24[%262, %c0_91] : memref<64x32xf32, #tpu.memory_space<vmem>>, vector<8x32xf32>
    %264 = arith.mulf %253, %245 : vector<8x32xf32>
    %265 = arith.addf %263, %264 : vector<8x32xf32>
    %266 = math.tanh %265 : vector<8x32xf32>
    %cst_92 = arith.constant 1.000000e+00 : f32
    %267 = vector.broadcast %cst_92 : f32 to vector<8x32xf32>
    %268 = arith.subf %267, %261 : vector<8x32xf32>
    %269 = arith.mulf %268, %266 : vector<8x32xf32>
    %270 = arith.mulf %261, %234 : vector<8x32xf32>
    %271 = arith.addf %269, %270 : vector<8x32xf32>
    %272 = vector.broadcast %c4_i32 : i32 to vector<8x1xi32>
    %273 = arith.cmpi slt, %272, %25 : vector<8x1xi32>
    %274 = arith.extui %273 : vector<8x1xi1> to vector<8x1xi32>
    %275 = arith.sitofp %274 : vector<8x1xi32> to vector<8x1xf32>
    %276 = vector.broadcast %275 : vector<8x1xf32> to vector<8x32xf32>
    %277 = arith.mulf %276, %271 : vector<8x32xf32>
    %278 = arith.index_cast %236 : i32 to index
    %c0_93 = arith.constant 0 : index
    %279 = vector.load %arg25[%278, %c0_93] : memref<64x32xf32, #tpu.memory_space<vmem>>, vector<8x32xf32>
    tpu.vector_store %arg25[%278, %c0_93], %277 {strides = array<i32>} : memref<64x32xf32, #tpu.memory_space<vmem>>, vector<8x32xf32>,
    %280 = vector.broadcast %275 : vector<8x1xf32> to vector<8x32xf32>
    %281 = arith.mulf %280, %271 : vector<8x32xf32>
    %cst_94 = arith.constant 1.000000e+00 : f32
    %282 = vector.broadcast %cst_94 : f32 to vector<8x1xf32>
    %283 = arith.subf %282, %275 : vector<8x1xf32>
    %284 = vector.broadcast %283 : vector<8x1xf32> to vector<8x32xf32>
    %285 = arith.mulf %284, %234 : vector<8x32xf32>
    %286 = arith.addf %281, %285 : vector<8x32xf32>
    %c5_i32 = arith.constant 5 : i32
    %c8_i32_95 = arith.constant 8 : i32
    %287 = arith.muli %c5_i32, %c8_i32_95 : i32
    %288 = tpu.assume_multiple %287, 8 : i32
    %cst_96 = arith.constant dense<0.000000e+00> : vector<8x32xf32>
    %289 = tpu.matmul %286, %19, %cst_96 {dimension_numbers = #tpu.dot_dimension_numbers<[1], [0], [0], [1], [0, 0, 1, 1], [], []>} : vector<8x32xf32>, vector<32x32xf32>, vector<8x32xf32> -> vector<8x32xf32>
    %290 = vector.broadcast %22 : vector<1x32xf32> to vector<8x32xf32>
    %291 = arith.addf %289, %290 : vector<8x32xf32>
    %cst_97 = arith.constant dense<0.000000e+00> : vector<8x32xf32>
    %292 = tpu.matmul %286, %20, %cst_97 {dimension_numbers = #tpu.dot_dimension_numbers<[1], [0], [0], [1], [0, 0, 1, 1], [], []>} : vector<8x32xf32>, vector<32x32xf32>, vector<8x32xf32> -> vector<8x32xf32>
    %293 = vector.broadcast %23 : vector<1x32xf32> to vector<8x32xf32>
    %294 = arith.addf %292, %293 : vector<8x32xf32>
    %cst_98 = arith.constant dense<0.000000e+00> : vector<8x32xf32>
    %295 = tpu.matmul %286, %21, %cst_98 {dimension_numbers = #tpu.dot_dimension_numbers<[1], [0], [0], [1], [0, 0, 1, 1], [], []>} : vector<8x32xf32>, vector<32x32xf32>, vector<8x32xf32> -> vector<8x32xf32>
    %296 = vector.broadcast %24 : vector<1x32xf32> to vector<8x32xf32>
    %297 = arith.addf %295, %296 : vector<8x32xf32>
    %298 = arith.index_cast %288 : i32 to index
    %c0_99 = arith.constant 0 : index
    %299 = vector.load %arg22[%298, %c0_99] : memref<64x32xf32, #tpu.memory_space<vmem>>, vector<8x32xf32>
    %300 = arith.addf %299, %291 : vector<8x32xf32>
    %301 = arith.negf %300 : vector<8x32xf32>
    %302 = math.exp %301 : vector<8x32xf32>
    %cst_100 = arith.constant 1.000000e+00 : f32
    %303 = vector.broadcast %cst_100 : f32 to vector<8x32xf32>
    %304 = arith.addf %303, %302 : vector<8x32xf32>
    %305 = arith.divf %303, %304 : vector<8x32xf32>
    %306 = arith.index_cast %288 : i32 to index
    %c0_101 = arith.constant 0 : index
    %307 = vector.load %arg23[%306, %c0_101] : memref<64x32xf32, #tpu.memory_space<vmem>>, vector<8x32xf32>
    %308 = arith.addf %307, %294 : vector<8x32xf32>
    %309 = arith.negf %308 : vector<8x32xf32>
    %310 = math.exp %309 : vector<8x32xf32>
    %cst_102 = arith.constant 1.000000e+00 : f32
    %311 = vector.broadcast %cst_102 : f32 to vector<8x32xf32>
    %312 = arith.addf %311, %310 : vector<8x32xf32>
    %313 = arith.divf %311, %312 : vector<8x32xf32>
    %314 = arith.index_cast %288 : i32 to index
    %c0_103 = arith.constant 0 : index
    %315 = vector.load %arg24[%314, %c0_103] : memref<64x32xf32, #tpu.memory_space<vmem>>, vector<8x32xf32>
    %316 = arith.mulf %305, %297 : vector<8x32xf32>
    %317 = arith.addf %315, %316 : vector<8x32xf32>
    %318 = math.tanh %317 : vector<8x32xf32>
    %cst_104 = arith.constant 1.000000e+00 : f32
    %319 = vector.broadcast %cst_104 : f32 to vector<8x32xf32>
    %320 = arith.subf %319, %313 : vector<8x32xf32>
    %321 = arith.mulf %320, %318 : vector<8x32xf32>
    %322 = arith.mulf %313, %286 : vector<8x32xf32>
    %323 = arith.addf %321, %322 : vector<8x32xf32>
    %324 = vector.broadcast %c5_i32 : i32 to vector<8x1xi32>
    %325 = arith.cmpi slt, %324, %25 : vector<8x1xi32>
    %326 = arith.extui %325 : vector<8x1xi1> to vector<8x1xi32>
    %327 = arith.sitofp %326 : vector<8x1xi32> to vector<8x1xf32>
    %328 = vector.broadcast %327 : vector<8x1xf32> to vector<8x32xf32>
    %329 = arith.mulf %328, %323 : vector<8x32xf32>
    %330 = arith.index_cast %288 : i32 to index
    %c0_105 = arith.constant 0 : index
    %331 = vector.load %arg25[%330, %c0_105] : memref<64x32xf32, #tpu.memory_space<vmem>>, vector<8x32xf32>
    tpu.vector_store %arg25[%330, %c0_105], %329 {strides = array<i32>} : memref<64x32xf32, #tpu.memory_space<vmem>>, vector<8x32xf32>,
    %332 = vector.broadcast %327 : vector<8x1xf32> to vector<8x32xf32>
    %333 = arith.mulf %332, %323 : vector<8x32xf32>
    %cst_106 = arith.constant 1.000000e+00 : f32
    %334 = vector.broadcast %cst_106 : f32 to vector<8x1xf32>
    %335 = arith.subf %334, %327 : vector<8x1xf32>
    %336 = vector.broadcast %335 : vector<8x1xf32> to vector<8x32xf32>
    %337 = arith.mulf %336, %286 : vector<8x32xf32>
    %338 = arith.addf %333, %337 : vector<8x32xf32>
    %c6_i32 = arith.constant 6 : i32
    %c8_i32_107 = arith.constant 8 : i32
    %339 = arith.muli %c6_i32, %c8_i32_107 : i32
    %340 = tpu.assume_multiple %339, 8 : i32
    %cst_108 = arith.constant dense<0.000000e+00> : vector<8x32xf32>
    %341 = tpu.matmul %338, %19, %cst_108 {dimension_numbers = #tpu.dot_dimension_numbers<[1], [0], [0], [1], [0, 0, 1, 1], [], []>} : vector<8x32xf32>, vector<32x32xf32>, vector<8x32xf32> -> vector<8x32xf32>
    %342 = vector.broadcast %22 : vector<1x32xf32> to vector<8x32xf32>
    %343 = arith.addf %341, %342 : vector<8x32xf32>
    %cst_109 = arith.constant dense<0.000000e+00> : vector<8x32xf32>
    %344 = tpu.matmul %338, %20, %cst_109 {dimension_numbers = #tpu.dot_dimension_numbers<[1], [0], [0], [1], [0, 0, 1, 1], [], []>} : vector<8x32xf32>, vector<32x32xf32>, vector<8x32xf32> -> vector<8x32xf32>
    %345 = vector.broadcast %23 : vector<1x32xf32> to vector<8x32xf32>
    %346 = arith.addf %344, %345 : vector<8x32xf32>
    %cst_110 = arith.constant dense<0.000000e+00> : vector<8x32xf32>
    %347 = tpu.matmul %338, %21, %cst_110 {dimension_numbers = #tpu.dot_dimension_numbers<[1], [0], [0], [1], [0, 0, 1, 1], [], []>} : vector<8x32xf32>, vector<32x32xf32>, vector<8x32xf32> -> vector<8x32xf32>
    %348 = vector.broadcast %24 : vector<1x32xf32> to vector<8x32xf32>
    %349 = arith.addf %347, %348 : vector<8x32xf32>
    %350 = arith.index_cast %340 : i32 to index
    %c0_111 = arith.constant 0 : index
    %351 = vector.load %arg22[%350, %c0_111] : memref<64x32xf32, #tpu.memory_space<vmem>>, vector<8x32xf32>
    %352 = arith.addf %351, %343 : vector<8x32xf32>
    %353 = arith.negf %352 : vector<8x32xf32>
    %354 = math.exp %353 : vector<8x32xf32>
    %cst_112 = arith.constant 1.000000e+00 : f32
    %355 = vector.broadcast %cst_112 : f32 to vector<8x32xf32>
    %356 = arith.addf %355, %354 : vector<8x32xf32>
    %357 = arith.divf %355, %356 : vector<8x32xf32>
    %358 = arith.index_cast %340 : i32 to index
    %c0_113 = arith.constant 0 : index
    %359 = vector.load %arg23[%358, %c0_113] : memref<64x32xf32, #tpu.memory_space<vmem>>, vector<8x32xf32>
    %360 = arith.addf %359, %346 : vector<8x32xf32>
    %361 = arith.negf %360 : vector<8x32xf32>
    %362 = math.exp %361 : vector<8x32xf32>
    %cst_114 = arith.constant 1.000000e+00 : f32
    %363 = vector.broadcast %cst_114 : f32 to vector<8x32xf32>
    %364 = arith.addf %363, %362 : vector<8x32xf32>
    %365 = arith.divf %363, %364 : vector<8x32xf32>
    %366 = arith.index_cast %340 : i32 to index
    %c0_115 = arith.constant 0 : index
    %367 = vector.load %arg24[%366, %c0_115] : memref<64x32xf32, #tpu.memory_space<vmem>>, vector<8x32xf32>
    %368 = arith.mulf %357, %349 : vector<8x32xf32>
    %369 = arith.addf %367, %368 : vector<8x32xf32>
    %370 = math.tanh %369 : vector<8x32xf32>
    %cst_116 = arith.constant 1.000000e+00 : f32
    %371 = vector.broadcast %cst_116 : f32 to vector<8x32xf32>
    %372 = arith.subf %371, %365 : vector<8x32xf32>
    %373 = arith.mulf %372, %370 : vector<8x32xf32>
    %374 = arith.mulf %365, %338 : vector<8x32xf32>
    %375 = arith.addf %373, %374 : vector<8x32xf32>
    %376 = vector.broadcast %c6_i32 : i32 to vector<8x1xi32>
    %377 = arith.cmpi slt, %376, %25 : vector<8x1xi32>
    %378 = arith.extui %377 : vector<8x1xi1> to vector<8x1xi32>
    %379 = arith.sitofp %378 : vector<8x1xi32> to vector<8x1xf32>
    %380 = vector.broadcast %379 : vector<8x1xf32> to vector<8x32xf32>
    %381 = arith.mulf %380, %375 : vector<8x32xf32>
    %382 = arith.index_cast %340 : i32 to index
    %c0_117 = arith.constant 0 : index
    %383 = vector.load %arg25[%382, %c0_117] : memref<64x32xf32, #tpu.memory_space<vmem>>, vector<8x32xf32>
    tpu.vector_store %arg25[%382, %c0_117], %381 {strides = array<i32>} : memref<64x32xf32, #tpu.memory_space<vmem>>, vector<8x32xf32>,
    %384 = vector.broadcast %379 : vector<8x1xf32> to vector<8x32xf32>
    %385 = arith.mulf %384, %375 : vector<8x32xf32>
    %cst_118 = arith.constant 1.000000e+00 : f32
    %386 = vector.broadcast %cst_118 : f32 to vector<8x1xf32>
    %387 = arith.subf %386, %379 : vector<8x1xf32>
    %388 = vector.broadcast %387 : vector<8x1xf32> to vector<8x32xf32>
    %389 = arith.mulf %388, %338 : vector<8x32xf32>
    %390 = arith.addf %385, %389 : vector<8x32xf32>
    %c7_i32 = arith.constant 7 : i32
    %c8_i32_119 = arith.constant 8 : i32
    %391 = arith.muli %c7_i32, %c8_i32_119 : i32
    %392 = tpu.assume_multiple %391, 8 : i32
    %cst_120 = arith.constant dense<0.000000e+00> : vector<8x32xf32>
    %393 = tpu.matmul %390, %19, %cst_120 {dimension_numbers = #tpu.dot_dimension_numbers<[1], [0], [0], [1], [0, 0, 1, 1], [], []>} : vector<8x32xf32>, vector<32x32xf32>, vector<8x32xf32> -> vector<8x32xf32>
    %394 = vector.broadcast %22 : vector<1x32xf32> to vector<8x32xf32>
    %395 = arith.addf %393, %394 : vector<8x32xf32>
    %cst_121 = arith.constant dense<0.000000e+00> : vector<8x32xf32>
    %396 = tpu.matmul %390, %20, %cst_121 {dimension_numbers = #tpu.dot_dimension_numbers<[1], [0], [0], [1], [0, 0, 1, 1], [], []>} : vector<8x32xf32>, vector<32x32xf32>, vector<8x32xf32> -> vector<8x32xf32>
    %397 = vector.broadcast %23 : vector<1x32xf32> to vector<8x32xf32>
    %398 = arith.addf %396, %397 : vector<8x32xf32>
    %cst_122 = arith.constant dense<0.000000e+00> : vector<8x32xf32>
    %399 = tpu.matmul %390, %21, %cst_122 {dimension_numbers = #tpu.dot_dimension_numbers<[1], [0], [0], [1], [0, 0, 1, 1], [], []>} : vector<8x32xf32>, vector<32x32xf32>, vector<8x32xf32> -> vector<8x32xf32>
    %400 = vector.broadcast %24 : vector<1x32xf32> to vector<8x32xf32>
    %401 = arith.addf %399, %400 : vector<8x32xf32>
    %402 = arith.index_cast %392 : i32 to index
    %c0_123 = arith.constant 0 : index
    %403 = vector.load %arg22[%402, %c0_123] : memref<64x32xf32, #tpu.memory_space<vmem>>, vector<8x32xf32>
    %404 = arith.addf %403, %395 : vector<8x32xf32>
    %405 = arith.negf %404 : vector<8x32xf32>
    %406 = math.exp %405 : vector<8x32xf32>
    %cst_124 = arith.constant 1.000000e+00 : f32
    %407 = vector.broadcast %cst_124 : f32 to vector<8x32xf32>
    %408 = arith.addf %407, %406 : vector<8x32xf32>
    %409 = arith.divf %407, %408 : vector<8x32xf32>
    %410 = arith.index_cast %392 : i32 to index
    %c0_125 = arith.constant 0 : index
    %411 = vector.load %arg23[%410, %c0_125] : memref<64x32xf32, #tpu.memory_space<vmem>>, vector<8x32xf32>
    %412 = arith.addf %411, %398 : vector<8x32xf32>
    %413 = arith.negf %412 : vector<8x32xf32>
    %414 = math.exp %413 : vector<8x32xf32>
    %cst_126 = arith.constant 1.000000e+00 : f32
    %415 = vector.broadcast %cst_126 : f32 to vector<8x32xf32>
    %416 = arith.addf %415, %414 : vector<8x32xf32>
    %417 = arith.divf %415, %416 : vector<8x32xf32>
    %418 = arith.index_cast %392 : i32 to index
    %c0_127 = arith.constant 0 : index
    %419 = vector.load %arg24[%418, %c0_127] : memref<64x32xf32, #tpu.memory_space<vmem>>, vector<8x32xf32>
    %420 = arith.mulf %409, %401 : vector<8x32xf32>
    %421 = arith.addf %419, %420 : vector<8x32xf32>
    %422 = math.tanh %421 : vector<8x32xf32>
    %cst_128 = arith.constant 1.000000e+00 : f32
    %423 = vector.broadcast %cst_128 : f32 to vector<8x32xf32>
    %424 = arith.subf %423, %417 : vector<8x32xf32>
    %425 = arith.mulf %424, %422 : vector<8x32xf32>
    %426 = arith.mulf %417, %390 : vector<8x32xf32>
    %427 = arith.addf %425, %426 : vector<8x32xf32>
    %428 = vector.broadcast %c7_i32 : i32 to vector<8x1xi32>
    %429 = arith.cmpi slt, %428, %25 : vector<8x1xi32>
    %430 = arith.extui %429 : vector<8x1xi1> to vector<8x1xi32>
    %431 = arith.sitofp %430 : vector<8x1xi32> to vector<8x1xf32>
    %432 = vector.broadcast %431 : vector<8x1xf32> to vector<8x32xf32>
    %433 = arith.mulf %432, %427 : vector<8x32xf32>
    %434 = arith.index_cast %392 : i32 to index
    %c0_129 = arith.constant 0 : index
    %435 = vector.load %arg25[%434, %c0_129] : memref<64x32xf32, #tpu.memory_space<vmem>>, vector<8x32xf32>
    tpu.vector_store %arg25[%434, %c0_129], %433 {strides = array<i32>} : memref<64x32xf32, #tpu.memory_space<vmem>>, vector<8x32xf32>,
    %436 = vector.broadcast %431 : vector<8x1xf32> to vector<8x32xf32>
    %437 = arith.mulf %436, %427 : vector<8x32xf32>
    %cst_130 = arith.constant 1.000000e+00 : f32
    %438 = vector.broadcast %cst_130 : f32 to vector<8x1xf32>
    %439 = arith.subf %438, %431 : vector<8x1xf32>
    %440 = vector.broadcast %439 : vector<8x1xf32> to vector<8x32xf32>
    %441 = arith.mulf %440, %390 : vector<8x32xf32>
    %442 = arith.addf %437, %441 : vector<8x32xf32>
    %c8_i32_131 = arith.constant 8 : i32
    %c0_132 = arith.constant 0 : index
    %c0_133 = arith.constant 0 : index
    %443 = vector.load %arg25[%c0_132, %c0_133] : memref<64x32xf32, #tpu.memory_space<vmem>>, vector<64x32xf32>
    %c0_134 = arith.constant 0 : index
    %c0_135 = arith.constant 0 : index
    %444 = vector.load %arg16[%c0_134, %c0_135] : memref<32x32xf32, #tpu.memory_space<vmem>>, vector<32x32xf32>
    %cst_136 = arith.constant dense<0.000000e+00> : vector<64x32xf32>
    %445 = tpu.matmul %443, %444, %cst_136 {dimension_numbers = #tpu.dot_dimension_numbers<[1], [0], [0], [1], [0, 0, 1, 1], [], []>} : vector<64x32xf32>, vector<32x32xf32>, vector<64x32xf32> -> vector<64x32xf32>
    %c0_137 = arith.constant 0 : index
    %c0_138 = arith.constant 0 : index
    %446 = vector.load %arg26[%c0_137, %c0_138] : memref<64x32xf32, #tpu.memory_space<vmem>>, vector<64x32xf32>
    tpu.vector_store %arg26[%c0_137, %c0_138], %445 {strides = array<i32>} : memref<64x32xf32, #tpu.memory_space<vmem>>, vector<64x32xf32>,
    %c0_139 = arith.constant 0 : index
    %c0_140 = arith.constant 0 : index
    %447 = vector.load %arg17[%c0_139, %c0_140] : memref<32x32xf32, #tpu.memory_space<vmem>>, vector<32x32xf32>
    %cst_141 = arith.constant dense<0.000000e+00> : vector<8x32xf32>
    %448 = tpu.matmul %442, %447, %cst_141 {dimension_numbers = #tpu.dot_dimension_numbers<[1], [0], [0], [1], [0, 0, 1, 1], [], []>} : vector<8x32xf32>, vector<32x32xf32>, vector<8x32xf32> -> vector<8x32xf32>
    %c0_142 = arith.constant 0 : index
    %c0_143 = arith.constant 0 : index
    %449 = vector.load %arg18[%c0_142, %c0_143] : memref<1x32xf32, #tpu.memory_space<vmem>>, vector<1x32xf32>
    %cst_144 = arith.constant 0.000000e+00 : f32
    %450 = vector.broadcast %cst_144 : f32 to vector<8x32xf32>
    %c0_i32_145 = arith.constant 0 : i32
    %c8_i32_146 = arith.constant 8 : i32
    %451 = arith.muli %c0_i32_145, %c8_i32_146 : i32
    %452 = tpu.assume_multiple %451, 8 : i32
    %453 = arith.index_cast %452 : i32 to index
    %c0_147 = arith.constant 0 : index
    %454 = vector.load %arg25[%453, %c0_147] : memref<64x32xf32, #tpu.memory_space<vmem>>, vector<8x32xf32>
    %455 = arith.index_cast %452 : i32 to index
    %c0_148 = arith.constant 0 : index
    %456 = vector.load %arg3[%455, %c0_148] : memref<64x1xf32, #tpu.memory_space<vmem>>, vector<8x1xf32>
    %457 = arith.index_cast %452 : i32 to index
    %c0_149 = arith.constant 0 : index
    %458 = vector.load %arg26[%457, %c0_149] : memref<64x32xf32, #tpu.memory_space<vmem>>, vector<8x32xf32>
    %459 = vector.broadcast %456 : vector<8x1xf32> to vector<8x32xf32>
    %460 = arith.mulf %459, %448 : vector<8x32xf32>
    %461 = arith.addf %458, %460 : vector<8x32xf32>
    %462 = arith.negf %461 : vector<8x32xf32>
    %463 = math.exp %462 : vector<8x32xf32>
    %cst_150 = arith.constant 1.000000e+00 : f32
    %464 = vector.broadcast %cst_150 : f32 to vector<8x32xf32>
    %465 = arith.addf %464, %463 : vector<8x32xf32>
    %466 = arith.divf %464, %465 : vector<8x32xf32>
    %467 = vector.broadcast %449 : vector<1x32xf32> to vector<8x32xf32>
    %468 = arith.mulf %466, %467 : vector<8x32xf32>
    %cst_151 = arith.constant dense<0.000000e+00> : vector<8xf32>
    %469 = vector.multi_reduction <add>, %468, %cst_151 [1] : vector<8x32xf32> to vector<8xf32>
    %470 = vector.shape_cast %469 : vector<8xf32> to vector<8x1xf32>
    %471 = vector.broadcast %470 : vector<8x1xf32> to vector<8x32xf32>
    %472 = arith.mulf %471, %454 : vector<8x32xf32>
    %473 = arith.addf %450, %472 : vector<8x32xf32>
    %c1_i32_152 = arith.constant 1 : i32
    %c8_i32_153 = arith.constant 8 : i32
    %474 = arith.muli %c1_i32_152, %c8_i32_153 : i32
    %475 = tpu.assume_multiple %474, 8 : i32
    %476 = arith.index_cast %475 : i32 to index
    %c0_154 = arith.constant 0 : index
    %477 = vector.load %arg25[%476, %c0_154] : memref<64x32xf32, #tpu.memory_space<vmem>>, vector<8x32xf32>
    %478 = arith.index_cast %475 : i32 to index
    %c0_155 = arith.constant 0 : index
    %479 = vector.load %arg3[%478, %c0_155] : memref<64x1xf32, #tpu.memory_space<vmem>>, vector<8x1xf32>
    %480 = arith.index_cast %475 : i32 to index
    %c0_156 = arith.constant 0 : index
    %481 = vector.load %arg26[%480, %c0_156] : memref<64x32xf32, #tpu.memory_space<vmem>>, vector<8x32xf32>
    %482 = vector.broadcast %479 : vector<8x1xf32> to vector<8x32xf32>
    %483 = arith.mulf %482, %448 : vector<8x32xf32>
    %484 = arith.addf %481, %483 : vector<8x32xf32>
    %485 = arith.negf %484 : vector<8x32xf32>
    %486 = math.exp %485 : vector<8x32xf32>
    %cst_157 = arith.constant 1.000000e+00 : f32
    %487 = vector.broadcast %cst_157 : f32 to vector<8x32xf32>
    %488 = arith.addf %487, %486 : vector<8x32xf32>
    %489 = arith.divf %487, %488 : vector<8x32xf32>
    %490 = vector.broadcast %449 : vector<1x32xf32> to vector<8x32xf32>
    %491 = arith.mulf %489, %490 : vector<8x32xf32>
    %cst_158 = arith.constant dense<0.000000e+00> : vector<8xf32>
    %492 = vector.multi_reduction <add>, %491, %cst_158 [1] : vector<8x32xf32> to vector<8xf32>
    %493 = vector.shape_cast %492 : vector<8xf32> to vector<8x1xf32>
    %494 = vector.broadcast %493 : vector<8x1xf32> to vector<8x32xf32>
    %495 = arith.mulf %494, %477 : vector<8x32xf32>
    %496 = arith.addf %473, %495 : vector<8x32xf32>
    %c2_i32_159 = arith.constant 2 : i32
    %c8_i32_160 = arith.constant 8 : i32
    %497 = arith.muli %c2_i32_159, %c8_i32_160 : i32
    %498 = tpu.assume_multiple %497, 8 : i32
    %499 = arith.index_cast %498 : i32 to index
    %c0_161 = arith.constant 0 : index
    %500 = vector.load %arg25[%499, %c0_161] : memref<64x32xf32, #tpu.memory_space<vmem>>, vector<8x32xf32>
    %501 = arith.index_cast %498 : i32 to index
    %c0_162 = arith.constant 0 : index
    %502 = vector.load %arg3[%501, %c0_162] : memref<64x1xf32, #tpu.memory_space<vmem>>, vector<8x1xf32>
    %503 = arith.index_cast %498 : i32 to index
    %c0_163 = arith.constant 0 : index
    %504 = vector.load %arg26[%503, %c0_163] : memref<64x32xf32, #tpu.memory_space<vmem>>, vector<8x32xf32>
    %505 = vector.broadcast %502 : vector<8x1xf32> to vector<8x32xf32>
    %506 = arith.mulf %505, %448 : vector<8x32xf32>
    %507 = arith.addf %504, %506 : vector<8x32xf32>
    %508 = arith.negf %507 : vector<8x32xf32>
    %509 = math.exp %508 : vector<8x32xf32>
    %cst_164 = arith.constant 1.000000e+00 : f32
    %510 = vector.broadcast %cst_164 : f32 to vector<8x32xf32>
    %511 = arith.addf %510, %509 : vector<8x32xf32>
    %512 = arith.divf %510, %511 : vector<8x32xf32>
    %513 = vector.broadcast %449 : vector<1x32xf32> to vector<8x32xf32>
    %514 = arith.mulf %512, %513 : vector<8x32xf32>
    %cst_165 = arith.constant dense<0.000000e+00> : vector<8xf32>
    %515 = vector.multi_reduction <add>, %514, %cst_165 [1] : vector<8x32xf32> to vector<8xf32>
    %516 = vector.shape_cast %515 : vector<8xf32> to vector<8x1xf32>
    %517 = vector.broadcast %516 : vector<8x1xf32> to vector<8x32xf32>
    %518 = arith.mulf %517, %500 : vector<8x32xf32>
    %519 = arith.addf %496, %518 : vector<8x32xf32>
    %c3_i32_166 = arith.constant 3 : i32
    %c8_i32_167 = arith.constant 8 : i32
    %520 = arith.muli %c3_i32_166, %c8_i32_167 : i32
    %521 = tpu.assume_multiple %520, 8 : i32
    %522 = arith.index_cast %521 : i32 to index
    %c0_168 = arith.constant 0 : index
    %523 = vector.load %arg25[%522, %c0_168] : memref<64x32xf32, #tpu.memory_space<vmem>>, vector<8x32xf32>
    %524 = arith.index_cast %521 : i32 to index
    %c0_169 = arith.constant 0 : index
    %525 = vector.load %arg3[%524, %c0_169] : memref<64x1xf32, #tpu.memory_space<vmem>>, vector<8x1xf32>
    %526 = arith.index_cast %521 : i32 to index
    %c0_170 = arith.constant 0 : index
    %527 = vector.load %arg26[%526, %c0_170] : memref<64x32xf32, #tpu.memory_space<vmem>>, vector<8x32xf32>
    %528 = vector.broadcast %525 : vector<8x1xf32> to vector<8x32xf32>
    %529 = arith.mulf %528, %448 : vector<8x32xf32>
    %530 = arith.addf %527, %529 : vector<8x32xf32>
    %531 = arith.negf %530 : vector<8x32xf32>
    %532 = math.exp %531 : vector<8x32xf32>
    %cst_171 = arith.constant 1.000000e+00 : f32
    %533 = vector.broadcast %cst_171 : f32 to vector<8x32xf32>
    %534 = arith.addf %533, %532 : vector<8x32xf32>
    %535 = arith.divf %533, %534 : vector<8x32xf32>
    %536 = vector.broadcast %449 : vector<1x32xf32> to vector<8x32xf32>
    %537 = arith.mulf %535, %536 : vector<8x32xf32>
    %cst_172 = arith.constant dense<0.000000e+00> : vector<8xf32>
    %538 = vector.multi_reduction <add>, %537, %cst_172 [1] : vector<8x32xf32> to vector<8xf32>
    %539 = vector.shape_cast %538 : vector<8xf32> to vector<8x1xf32>
    %540 = vector.broadcast %539 : vector<8x1xf32> to vector<8x32xf32>
    %541 = arith.mulf %540, %523 : vector<8x32xf32>
    %542 = arith.addf %519, %541 : vector<8x32xf32>
    %c4_i32_173 = arith.constant 4 : i32
    %c8_i32_174 = arith.constant 8 : i32
    %543 = arith.muli %c4_i32_173, %c8_i32_174 : i32
    %544 = tpu.assume_multiple %543, 8 : i32
    %545 = arith.index_cast %544 : i32 to index
    %c0_175 = arith.constant 0 : index
    %546 = vector.load %arg25[%545, %c0_175] : memref<64x32xf32, #tpu.memory_space<vmem>>, vector<8x32xf32>
    %547 = arith.index_cast %544 : i32 to index
    %c0_176 = arith.constant 0 : index
    %548 = vector.load %arg3[%547, %c0_176] : memref<64x1xf32, #tpu.memory_space<vmem>>, vector<8x1xf32>
    %549 = arith.index_cast %544 : i32 to index
    %c0_177 = arith.constant 0 : index
    %550 = vector.load %arg26[%549, %c0_177] : memref<64x32xf32, #tpu.memory_space<vmem>>, vector<8x32xf32>
    %551 = vector.broadcast %548 : vector<8x1xf32> to vector<8x32xf32>
    %552 = arith.mulf %551, %448 : vector<8x32xf32>
    %553 = arith.addf %550, %552 : vector<8x32xf32>
    %554 = arith.negf %553 : vector<8x32xf32>
    %555 = math.exp %554 : vector<8x32xf32>
    %cst_178 = arith.constant 1.000000e+00 : f32
    %556 = vector.broadcast %cst_178 : f32 to vector<8x32xf32>
    %557 = arith.addf %556, %555 : vector<8x32xf32>
    %558 = arith.divf %556, %557 : vector<8x32xf32>
    %559 = vector.broadcast %449 : vector<1x32xf32> to vector<8x32xf32>
    %560 = arith.mulf %558, %559 : vector<8x32xf32>
    %cst_179 = arith.constant dense<0.000000e+00> : vector<8xf32>
    %561 = vector.multi_reduction <add>, %560, %cst_179 [1] : vector<8x32xf32> to vector<8xf32>
    %562 = vector.shape_cast %561 : vector<8xf32> to vector<8x1xf32>
    %563 = vector.broadcast %562 : vector<8x1xf32> to vector<8x32xf32>
    %564 = arith.mulf %563, %546 : vector<8x32xf32>
    %565 = arith.addf %542, %564 : vector<8x32xf32>
    %c5_i32_180 = arith.constant 5 : i32
    %c8_i32_181 = arith.constant 8 : i32
    %566 = arith.muli %c5_i32_180, %c8_i32_181 : i32
    %567 = tpu.assume_multiple %566, 8 : i32
    %568 = arith.index_cast %567 : i32 to index
    %c0_182 = arith.constant 0 : index
    %569 = vector.load %arg25[%568, %c0_182] : memref<64x32xf32, #tpu.memory_space<vmem>>, vector<8x32xf32>
    %570 = arith.index_cast %567 : i32 to index
    %c0_183 = arith.constant 0 : index
    %571 = vector.load %arg3[%570, %c0_183] : memref<64x1xf32, #tpu.memory_space<vmem>>, vector<8x1xf32>
    %572 = arith.index_cast %567 : i32 to index
    %c0_184 = arith.constant 0 : index
    %573 = vector.load %arg26[%572, %c0_184] : memref<64x32xf32, #tpu.memory_space<vmem>>, vector<8x32xf32>
    %574 = vector.broadcast %571 : vector<8x1xf32> to vector<8x32xf32>
    %575 = arith.mulf %574, %448 : vector<8x32xf32>
    %576 = arith.addf %573, %575 : vector<8x32xf32>
    %577 = arith.negf %576 : vector<8x32xf32>
    %578 = math.exp %577 : vector<8x32xf32>
    %cst_185 = arith.constant 1.000000e+00 : f32
    %579 = vector.broadcast %cst_185 : f32 to vector<8x32xf32>
    %580 = arith.addf %579, %578 : vector<8x32xf32>
    %581 = arith.divf %579, %580 : vector<8x32xf32>
    %582 = vector.broadcast %449 : vector<1x32xf32> to vector<8x32xf32>
    %583 = arith.mulf %581, %582 : vector<8x32xf32>
    %cst_186 = arith.constant dense<0.000000e+00> : vector<8xf32>
    %584 = vector.multi_reduction <add>, %583, %cst_186 [1] : vector<8x32xf32> to vector<8xf32>
    %585 = vector.shape_cast %584 : vector<8xf32> to vector<8x1xf32>
    %586 = vector.broadcast %585 : vector<8x1xf32> to vector<8x32xf32>
    %587 = arith.mulf %586, %569 : vector<8x32xf32>
    %588 = arith.addf %565, %587 : vector<8x32xf32>
    %c6_i32_187 = arith.constant 6 : i32
    %c8_i32_188 = arith.constant 8 : i32
    %589 = arith.muli %c6_i32_187, %c8_i32_188 : i32
    %590 = tpu.assume_multiple %589, 8 : i32
    %591 = arith.index_cast %590 : i32 to index
    %c0_189 = arith.constant 0 : index
    %592 = vector.load %arg25[%591, %c0_189] : memref<64x32xf32, #tpu.memory_space<vmem>>, vector<8x32xf32>
    %593 = arith.index_cast %590 : i32 to index
    %c0_190 = arith.constant 0 : index
    %594 = vector.load %arg3[%593, %c0_190] : memref<64x1xf32, #tpu.memory_space<vmem>>, vector<8x1xf32>
    %595 = arith.index_cast %590 : i32 to index
    %c0_191 = arith.constant 0 : index
    %596 = vector.load %arg26[%595, %c0_191] : memref<64x32xf32, #tpu.memory_space<vmem>>, vector<8x32xf32>
    %597 = vector.broadcast %594 : vector<8x1xf32> to vector<8x32xf32>
    %598 = arith.mulf %597, %448 : vector<8x32xf32>
    %599 = arith.addf %596, %598 : vector<8x32xf32>
    %600 = arith.negf %599 : vector<8x32xf32>
    %601 = math.exp %600 : vector<8x32xf32>
    %cst_192 = arith.constant 1.000000e+00 : f32
    %602 = vector.broadcast %cst_192 : f32 to vector<8x32xf32>
    %603 = arith.addf %602, %601 : vector<8x32xf32>
    %604 = arith.divf %602, %603 : vector<8x32xf32>
    %605 = vector.broadcast %449 : vector<1x32xf32> to vector<8x32xf32>
    %606 = arith.mulf %604, %605 : vector<8x32xf32>
    %cst_193 = arith.constant dense<0.000000e+00> : vector<8xf32>
    %607 = vector.multi_reduction <add>, %606, %cst_193 [1] : vector<8x32xf32> to vector<8xf32>
    %608 = vector.shape_cast %607 : vector<8xf32> to vector<8x1xf32>
    %609 = vector.broadcast %608 : vector<8x1xf32> to vector<8x32xf32>
    %610 = arith.mulf %609, %592 : vector<8x32xf32>
    %611 = arith.addf %588, %610 : vector<8x32xf32>
    %c7_i32_194 = arith.constant 7 : i32
    %c8_i32_195 = arith.constant 8 : i32
    %612 = arith.muli %c7_i32_194, %c8_i32_195 : i32
    %613 = tpu.assume_multiple %612, 8 : i32
    %614 = arith.index_cast %613 : i32 to index
    %c0_196 = arith.constant 0 : index
    %615 = vector.load %arg25[%614, %c0_196] : memref<64x32xf32, #tpu.memory_space<vmem>>, vector<8x32xf32>
    %616 = arith.index_cast %613 : i32 to index
    %c0_197 = arith.constant 0 : index
    %617 = vector.load %arg3[%616, %c0_197] : memref<64x1xf32, #tpu.memory_space<vmem>>, vector<8x1xf32>
    %618 = arith.index_cast %613 : i32 to index
    %c0_198 = arith.constant 0 : index
    %619 = vector.load %arg26[%618, %c0_198] : memref<64x32xf32, #tpu.memory_space<vmem>>, vector<8x32xf32>
    %620 = vector.broadcast %617 : vector<8x1xf32> to vector<8x32xf32>
    %621 = arith.mulf %620, %448 : vector<8x32xf32>
    %622 = arith.addf %619, %621 : vector<8x32xf32>
    %623 = arith.negf %622 : vector<8x32xf32>
    %624 = math.exp %623 : vector<8x32xf32>
    %cst_199 = arith.constant 1.000000e+00 : f32
    %625 = vector.broadcast %cst_199 : f32 to vector<8x32xf32>
    %626 = arith.addf %625, %624 : vector<8x32xf32>
    %627 = arith.divf %625, %626 : vector<8x32xf32>
    %628 = vector.broadcast %449 : vector<1x32xf32> to vector<8x32xf32>
    %629 = arith.mulf %627, %628 : vector<8x32xf32>
    %cst_200 = arith.constant dense<0.000000e+00> : vector<8xf32>
    %630 = vector.multi_reduction <add>, %629, %cst_200 [1] : vector<8x32xf32> to vector<8xf32>
    %631 = vector.shape_cast %630 : vector<8xf32> to vector<8x1xf32>
    %632 = vector.broadcast %631 : vector<8x1xf32> to vector<8x32xf32>
    %633 = arith.mulf %632, %615 : vector<8x32xf32>
    %634 = arith.addf %611, %633 : vector<8x32xf32>
    %c8_i32_201 = arith.constant 8 : i32
    %635 = tpu.concatenate %634, %442 in 1 : vector<8x32xf32>, vector<8x32xf32> -> vector<8x64xf32>
    %c0_202 = arith.constant 0 : index
    %c0_203 = arith.constant 0 : index
    %636 = vector.load %arg20[%c0_202, %c0_203] : memref<8x64xf32, #tpu.memory_space<vmem>>, vector<8x64xf32>
    tpu.vector_store %arg20[%c0_202, %c0_203], %635 {strides = array<i32>} : memref<8x64xf32, #tpu.memory_space<vmem>>, vector<8x64xf32>,
    %c0_204 = arith.constant 0 : index
    %c0_205 = arith.constant 0 : index
    %637 = vector.load %arg19[%c0_204, %c0_205] : memref<64x32xf32, #tpu.memory_space<vmem>>, vector<64x32xf32>
    %cst_206 = arith.constant dense<0.000000e+00> : vector<8x32xf32>
    %638 = tpu.matmul %635, %637, %cst_206 {dimension_numbers = #tpu.dot_dimension_numbers<[1], [0], [0], [1], [0, 0, 1, 1], [], []>} : vector<8x64xf32>, vector<64x32xf32>, vector<8x32xf32> -> vector<8x32xf32>
    %639 = arith.truncf %638 : vector<8x32xf32> to vector<8x32xbf16>
    %c0_207 = arith.constant 0 : index
    %c0_208 = arith.constant 0 : index
    %640 = vector.load %arg21[%c0_207, %c0_208] : memref<8x32xbf16, #tpu.memory_space<vmem>>, vector<8x32xbf16>
    tpu.vector_store %arg21[%c0_207, %c0_208], %639 {strides = array<i32>} : memref<8x32xbf16, #tpu.memory_space<vmem>>, vector<8x32xbf16>,
    return
  }
  func.func @transform_0(%arg0: i32) -> (i32, i32) {
    %c0_i32 = arith.constant 0 : i32
    %c0_i32_0 = arith.constant 0 : i32
    %c0_i32_1 = arith.constant 0 : i32
    return %c0_i32, %c0_i32_0 : i32, i32
  }
  func.func @transform_1(%arg0: i32) -> (i32, i32) {
    %c0_i32 = arith.constant 0 : i32
    %c0_i32_0 = arith.constant 0 : i32
    %c0_i32_1 = arith.constant 0 : i32
    return %c0_i32, %c0_i32_0 : i32, i32
  }
  func.func @transform_2(%arg0: i32) -> (i32, i32) {
    %c0_i32 = arith.constant 0 : i32
    %c0_i32_0 = arith.constant 0 : i32
    %c0_i32_1 = arith.constant 0 : i32
    return %c0_i32, %c0_i32_0 : i32, i32
  }
  func.func @transform_3(%arg0: i32) -> (i32, i32) {
    %c0_i32 = arith.constant 0 : i32
    %c0_i32_0 = arith.constant 0 : i32
    %c0_i32_1 = arith.constant 0 : i32
    return %c0_i32, %c0_i32_0 : i32, i32
  }
  func.func @transform_4(%arg0: i32) -> (i32, i32) {
    %c0_i32 = arith.constant 0 : i32
    %c0_i32_0 = arith.constant 0 : i32
    %c0_i32_1 = arith.constant 0 : i32
    return %c0_i32, %c0_i32_0 : i32, i32
  }
  func.func @transform_5(%arg0: i32) -> (i32, i32) {
    %c0_i32 = arith.constant 0 : i32
    %c0_i32_0 = arith.constant 0 : i32
    %c0_i32_1 = arith.constant 0 : i32
    return %c0_i32, %c0_i32_0 : i32, i32
  }
  func.func @transform_6(%arg0: i32) -> (i32, i32) {
    %c0_i32 = arith.constant 0 : i32
    %c0_i32_0 = arith.constant 0 : i32
    %c0_i32_1 = arith.constant 0 : i32
    return %c0_i32, %c0_i32_0 : i32, i32
  }
  func.func @transform_7(%arg0: i32) -> (i32, i32) {
    %c0_i32 = arith.constant 0 : i32
    %c0_i32_0 = arith.constant 0 : i32
    %c0_i32_1 = arith.constant 0 : i32
    return %c0_i32, %c0_i32_0 : i32, i32
  }
  func.func @transform_8(%arg0: i32) -> (i32, i32) {
    %c0_i32 = arith.constant 0 : i32
    %c0_i32_0 = arith.constant 0 : i32
    %c0_i32_1 = arith.constant 0 : i32
    return %c0_i32, %c0_i32_0 : i32, i32
  }
  func.func @transform_9(%arg0: i32) -> (i32, i32) {
    %c0_i32 = arith.constant 0 : i32
    %c0_i32_0 = arith.constant 0 : i32
    %c0_i32_1 = arith.constant 0 : i32
    return %c0_i32, %c0_i32_0 : i32, i32
  }
  func.func @transform_10(%arg0: i32) -> (i32, i32) {
    %c0_i32 = arith.constant 0 : i32
    %c0_i32_0 = arith.constant 0 : i32
    %c0_i32_1 = arith.constant 0 : i32
    return %c0_i32, %c0_i32_0 : i32, i32
  }
  func.func @transform_11(%arg0: i32) -> (i32, i32) {
    %c0_i32 = arith.constant 0 : i32
    %c0_i32_0 = arith.constant 0 : i32
    %c0_i32_1 = arith.constant 0 : i32
    return %c0_i32, %c0_i32_0 : i32, i32
  }
  func.func @transform_12(%arg0: i32) -> (i32, i32) {
    %c0_i32 = arith.constant 0 : i32
    %c0_i32_0 = arith.constant 0 : i32
    %c0_i32_1 = arith.constant 0 : i32
    return %c0_i32, %c0_i32_0 : i32, i32
  }
  func.func @transform_13(%arg0: i32) -> (i32, i32) {
    %c0_i32 = arith.constant 0 : i32
    %c0_i32_0 = arith.constant 0 : i32
    %c0_i32_1 = arith.constant 0 : i32
    return %c0_i32, %c0_i32_0 : i32, i32
  }
  func.func @transform_14(%arg0: i32) -> (i32, i32) {
    %c0_i32 = arith.constant 0 : i32
    %c0_i32_0 = arith.constant 0 : i32
    %c0_i32_1 = arith.constant 0 : i32
    return %c0_i32, %c0_i32_0 : i32, i32
  }
  func.func @transform_15(%arg0: i32) -> (i32, i32) {
    %c0_i32 = arith.constant 0 : i32
    %c0_i32_0 = arith.constant 0 : i32
    %c0_i32_1 = arith.constant 0 : i32
    return %c0_i32, %c0_i32_0 : i32, i32
  }
  func.func @transform_16(%arg0: i32) -> (i32, i32) {
    %c0_i32 = arith.constant 0 : i32
    %c0_i32_0 = arith.constant 0 : i32
    %c0_i32_1 = arith.constant 0 : i32
    return %c0_i32, %c0_i32_0 : i32, i32
  }
  func.func @transform_17(%arg0: i32) -> (i32, i32) {
    %c0_i32 = arith.constant 0 : i32
    %c0_i32_0 = arith.constant 0 : i32
    %c0_i32_1 = arith.constant 0 : i32
    return %c0_i32, %c0_i32_0 : i32, i32
  }
  func.func @transform_18(%arg0: i32) -> (i32, i32) {
    %c0_i32 = arith.constant 0 : i32
    %c0_i32_0 = arith.constant 0 : i32
    %c0_i32_1 = arith.constant 0 : i32
    return %c0_i32, %c0_i32_0 : i32, i32
  }
  func.func @transform_19(%arg0: i32) -> (i32, i32) {
    %c0_i32 = arith.constant 0 : i32
    %c0_i32_0 = arith.constant 0 : i32
    %c0_i32_1 = arith.constant 0 : i32
    return %c0_i32, %c0_i32_0 : i32, i32
  }
  func.func @transform_20(%arg0: i32) -> (i32, i32) {
    %c0_i32 = arith.constant 0 : i32
    %c0_i32_0 = arith.constant 0 : i32
    %c0_i32_1 = arith.constant 0 : i32
    return %c0_i32, %c0_i32_0 : i32, i32
  }
}

</mosaic_0001>

<bundles_post_ra>
// kernel: tpu_custom_call.1
= control target key start
LH: loop header
LB: loop body
LE: loop exit
PB: predicated region body
PF: predicated region fallthrough
CT: control target
= control target key end

     0   :  { %s4897_s0 = inlined_call_operand.vmem [shape: f32[64,32], index: 0, kind: input, shape index: {}]   ;;  %s4898_s1 = inlined_call_operand.vmem [shape: s32[8,1], index: 1, kind: input, shape index: {}]   ;;  %s4899_s2 = inlined_call_operand.vmem [shape: f32[64,1], index: 2, kind: input, shape index: {}]   ;;  %s4900_s3 = inlined_call_operand.vmem [shape: f32[32,32], index: 3, kind: input, shape index: {}]   ;;  %s4901_s4 = inlined_call_operand.vmem [shape: f32[32,32], index: 4, kind: input, shape index: {}]   ;;  %s4902_s5 = inlined_call_operand.vmem [shape: f32[32,32], index: 5, kind: input, shape index: {}]   ;;  %s4903_s6 = inlined_call_operand.hbm [shape: f32[1,32], index: 6, kind: input, shape index: {}]   ;;  %s4904_s7 = inlined_call_operand.vmem [shape: f32[1,32], index: 7, kind: input, shape index: {}]   ;;  %s4905_s8 = inlined_call_operand.vmem [shape: f32[1,32], index: 8, kind: input, shape index: {}]   ;;  %s4906_s9 = inlined_call_operand.vmem [shape: f32[32,32], index: 9, kind: input, shape index: {}]   ;;  %s4907_s10 = inlined_call_operand.vmem [shape: f32[32,32], index: 10, kind: input, shape index: {}]   ;;  %s4908_s11 = inlined_call_operand.vmem [shape: f32[32,32], index: 11, kind: input, shape index: {}]   ;;  %s4909_s12 = inlined_call_operand.vmem [shape: f32[1,32], index: 12, kind: input, shape index: {}]   ;;  %s4910_s13 = inlined_call_operand.vmem [shape: f32[1,32], index: 13, kind: input, shape index: {}]   ;;  %s4911_s14 = inlined_call_operand.vmem [shape: f32[1,32], index: 14, kind: input, shape index: {}]   ;;  %s4912_s15 = inlined_call_operand.vmem [shape: f32[32,32], index: 15, kind: input, shape index: {}]   ;;  %s4913_s16 = inlined_call_operand.vmem [shape: f32[32,32], index: 16, kind: input, shape index: {}]   ;;  %s4914_s17 = inlined_call_operand.vmem [shape: f32[1,32], index: 17, kind: input, shape index: {}]   ;;  %s4915_s18 = inlined_call_operand.vmem [shape: f32[64,32], index: 18, kind: input, shape index: {}]   ;;  %s4916_s19 = inlined_call_operand.hbm [shape: f32[8,64], index: 19, kind: output, shape index: {0}]   ;;  %s4917_s20 = inlined_call_operand.hbm [shape: bf16[8,32], index: 20, kind: output, shape index: {1}]  }
   0x1   :  { %4922 = sst [smem:[#allocation16_spill]] %s4897_s0 }
   0x2   :  { %4923 = sst [smem:[#allocation17_spill]] %s4898_s1 }
   0x3   :  { %4924 = sst [smem:[#allocation18_spill]] %s4899_s2 }
   0x4   :  { %4925 = sst [smem:[#allocation19_spill]] %s4900_s3 }
   0x5   :  { %4926 = sst [smem:[#allocation20_spill]] %s4901_s4 }
   0x6   :  { %26 = vsyncpa [#allocation8], 0 }
   0x7   :  { %27 = vsyncpa [#allocation9], 0 }
   0x8   :  { %28 = vsyncpa [#allocation12], 0  ;;  %s4176_s1 = smov [#allocation7]   ;;  %s4104_s2 = scalar_lea.hbm %s4903_s6, 16 }
   0x9   :  { %s47_s22 = sshll.u32 %s4176_s1, 4  ;;  %p4105_p0 = scmp.ne.s32.totalorder %s4903_s6, %s4104_s2  ;;  %s48_s22 = int_to_ptr.vmem [resolvable:$true] %s47_s22 }
   0xa   :  { %p4108_p1 = scmp.lt.u32.totalorder %s4104_s2, %s4903_s6 }
   0xc   :  { %p4110_p2 = pnand %p4108_p1, %p4105_p0 }
   0xe   :  { %4113 = shalt.err (!%p4110_p2)
}
   0xf   :  { %s4114_s28 = scalar_lea.vmem %s48_s22, 16  ;;  %s4118_s4 = scalar_lea.vmem %s48_s22, 32 }
  0x10   :  { %p4115_p3 = scmp.ne.s32.totalorder %s48_s22, %s4114_s28  ;;  %p4119_p4 = scmp.lt.s32.totalorder %s48_s22, %s48_s22 }
  0x11   :  { %p4120_p5 = scmp.lt.s32.totalorder %s4118_s4, %s4114_s28 }
  0x13   :  { %p4121_p6 = por %p4120_p5, %p4119_p4 }
  0x15   :  { %p4122_p7 = pnand %p4121_p6, %p4115_p3 }
  0x17   :  { %4125 = shalt.err (!%p4122_p7)
}
  0x18   :  { %50 = dma.hbm_to_vmem [thread:$0]  %s4903_s6, 16, %s48_s22, [#allocation8]  }
  0x19   :  { %4170 = dma.done.wait [#allocation8], 16  }
  0x1a   :  { %4171 = vsyncadd [#allocation8], 4294967280  ;;  %v4177_v0 = vmov 0   ;;  %vm97_vm0 = vcmask 261120   ;;  %s4927_s1 = sld [smem:[#allocation19_spill]]  ;;  %s4928_s27 = sld [smem:[#allocation16_spill]] }
  0x1b   :  { %3990 = vset.pattern.permute.xlu0 %v4177_v0  ;;  %3991 = vset.pattern.permute.xlu1 %v4177_v0  ;;  %s4929_s29 = sld [smem:[#allocation20_spill]]  ;;  %v359_v14 = vld [vmem:[%s4902_s5] sm:$0xff]  ;;  %v360_v15 = vld [vmem:[%s4902_s5 + $0x8] sm:$0xff]  ;;  %v361_v18 = vld [vmem:[%s4902_s5 + $0x10] sm:$0xff]  ;;  %s4930_s22 = sld [smem:[#allocation17_spill]]  ;;  %v4178_v33 = vmov 0.0  }
  0x1c   :  { %v3800_v17 = vpack.c.bf16 %v360_v15, %v359_v14  ;;  %v362_v21 = vld [vmem:[%s4902_s5 + $0x18] sm:$0xff]  ;;  %v483_v26 = vld [vmem:[%s4906_s9] sm:$0xff]  ;;  %v484_v27 = vld [vmem:[%s4906_s9 + $0x8] sm:$0xff]  ;;  %v4179_v35 = vmov 0.0|0.0   ;;  %vm4180_vm5 = vmmov 0   ;;  %s4931_s2 = sld [smem:[#allocation18_spill]] }
  0x1d   :  { %v3804_v23 = vpack.c.bf16 %v362_v21, %v361_v18  ;;  %v491_v30 = vld [vmem:[%s4908_s11] sm:$0xff]  ;;  %v492_v31 = vld [vmem:[%s4908_s11 + $0x8] sm:$0xff]  ;;  %v4400_v32 = vpack.c.bf16 %v484_v27, %v483_v26  ;;  %v485_v36 = vld [vmem:[%s4906_s9 + $0x10] sm:$0xff]  ;;  %s4181_s3 = smov 32   ;;  %vm3012_vm10 = vcmask 523264  }
  0x1e   :  { %v486_v37 = vld [vmem:[%s4906_s9 + $0x18] sm:$0xff]  ;;  %v4412_v38 = vpack.c.bf16 %v492_v31, %v491_v30  ;;  %v493_v39 = vld [vmem:[%s4908_s11 + $0x10] sm:$0xff]  ;;  %v487_v47 = vld [vmem:[%s4907_s10] sm:$0xff] }
  0x1f   :  { %v494_v40 = vld [vmem:[%s4908_s11 + $0x18] sm:$0xff]  ;;  %v4423_v41 = vpack.c.bf16 %v486_v37, %v485_v36  ;;  %v488_v48 = vld [vmem:[%s4907_s10 + $0x8] sm:$0xff]  ;;  %v489_v51 = vld [vmem:[%s4907_s10 + $0x10] sm:$0xff] }
  0x20   :  { %v86_v1 = vld [vmem:[%s4927_s1] sm:$0xff]  ;;  %v87_v2 = vld [vmem:[%s4927_s1 + $0x8] sm:$0xff]  ;;  %v88_v3 = vld [vmem:[%s4927_s1 + $0x10] sm:$0xff]  ;;  %v4429_v42 = vpack.c.bf16 %v494_v40, %v493_v39  ;;  %v4465_v49 = vpack.c.bf16 %v488_v48, %v487_v47 }
  0x21   :  { %v3784_v4 = vpack.c.bf16 %v87_v2, %v86_v1  ;;  %v89_v5 = vld [vmem:[%s4927_s1 + $0x18] sm:$0xff]  ;;  %v4316_v6 = vld [vmem:[%s4928_s27 + $0x20] sm:$0xff]  ;;  %v236_v9 = vld [vmem:[%s4929_s29 + $0x8] sm:$0xff] }
  0x22   :  { %v3788_v7 = vpack.c.bf16 %v89_v5, %v88_v3  ;;  %3424 = vmatprep.mubr.msk.f32.mxu1 %vm97_vm0, %v4316_v6  ;;  %v235_v8 = vld [vmem:[%s4929_s29] sm:$0xff]  ;;  %v237_v12 = vld [vmem:[%s4929_s29 + $0x10] sm:$0xff]  ;;  %v238_v13 = vld [vmem:[%s4929_s29 + $0x18] sm:$0xff] }
  0x23   :  { %3978 = vmatprep.subr.bf16.mxu1 %v3784_v4  ;;  %3785 = vmatprep.subr.bf16.mxu0 %v3784_v4  ;;  %v3792_v10 = vpack.c.bf16 %v236_v9, %v235_v8  ;;  %v78_v11 = vld [vmem:[%s4928_s27] sm:$0xff]  ;;  %v4345_v16 = vld [vmem:[%s4928_s27 + $0x28] sm:$0xff]  ;;  %v4353_v19 = vld [vmem:[%s4928_s27 + $0x30] sm:$0xff]  ;;  %v3796_v20 = vpack.c.bf16 %v238_v13, %v237_v12 }
  0x24   :  { %3980 = vmatpush3.bf16.msra.mxu1 %v3784_v4  ;;  %3787 = vmatpush3.bf16.msra.mxu0 %v3784_v4  ;;  %v79_v22 = vld [vmem:[%s4928_s27 + $0x8] sm:$0xff]  ;;  %v4364_v24 = vld [vmem:[%s4930_s22] sm:$0xff]  ;;  %v4374_v25 = vld [vmem:[%s4928_s27 + $0x38] sm:$0xff] }
  0x25   :  { %3979 = vmatprep.subr.bf16.mxu1 %v3788_v7  ;;  %3789 = vmatprep.subr.bf16.mxu0 %v3788_v7  ;;  %v80_v28 = vld [vmem:[%s4928_s27 + $0x10] sm:$0xff]  ;;  %vm754_vm1 = vcmp.gt.s32.totalorder %v4364_v24, 0  ;;  %v81_v29 = vld [vmem:[%s4928_s27 + $0x18] sm:$0xff]  ;;  %vm1012_vm2 = vcmp.gt.s32.totalorder %v4364_v24, 1  ;;  %vm1271_vm3 = vcmp.gt.s32.totalorder %v4364_v24, 2  ;;  %vm1530_vm4 = vcmp.gt.s32.totalorder %v4364_v24, 3 }
  0x26   :  { %3418 = vmatprep.mubr.msk.f32.mxu0 %vm97_vm0, %v78_v11  ;;  %v3159_v34 = vsel %vm754_vm1, 1.0, %v4178_v33  ;;  %v3165_v44 = vsel %vm1012_vm2, 1.0, %v4178_v33  ;;  %v3171_v45 = vsel %vm1271_vm3, 1.0, %v4178_v33  ;;  %v3177_v50 = vsel %vm1530_vm4, 1.0, %v4178_v33  ;;  %v490_v52 = vld [vmem:[%s4907_s10 + $0x18] sm:$0xff]  ;;  %v2813_v62 = vld [vmem:[%s4931_s2] sm:$0xff] }
  0x27   :  { %759 = vperm.xlu0 %3990, %v3159_v34   ;;  %v764_v43 = vsub.f32 1.0, %v3159_v34  ;;  %1017 = vperm.xlu1 %3991, %v3165_v44   ;;  %v1023_v46 = vsub.f32 1.0, %v3165_v44  ;;  %vm1789_vm6 = vcmp.gt.s32.totalorder %v4364_v24, 4  ;;  %v4481_v53 = vpack.c.bf16 %v490_v52, %v489_v51  ;;  %v3215_v0 = vld [vmem:[%s4931_s2 + $0x10] sm:$0xff]  ;;  %v3219_v2 = vld [vmem:[%s4931_s2 + $0x20] sm:$0xff]  ;;  %v3213_v4 = vld [vmem:[%s4931_s2 + $0x8] sm:$0xff] }
  0x28   :  { %3981 = vmatpush3.bf16.msra.mxu1 %v3788_v7  ;;  %3791 = vmatpush3.bf16.msra.mxu0 %v3788_v7  ;;  %v1282_v54 = vsub.f32 1.0, %v3171_v45  ;;  %v3183_v55 = vsel %vm1789_vm6, 1.0, %v4178_v33  ;;  %vm2048_vm7 = vcmp.gt.s32.totalorder %v4364_v24, 5  ;;  %v1541_v57 = vsub.f32 1.0, %v3177_v50  ;;  %v3223_v3 = vld [vmem:[%s4931_s2 + $0x30] sm:$0xff]  ;;  %v3217_v5 = vld [vmem:[%s4931_s2 + $0x18] sm:$0xff] }
  0x29   :  { %3793 = vmatprep.subr.bf16.mxu1 %v3792_v10  ;;  %3801 = vmatprep.subr.bf16.mxu0 %v3800_v17  ;;  %v3189_v56 = vsel %vm2048_vm7, 1.0, %v4178_v33  ;;  %vm2307_vm8 = vcmp.gt.s32.totalorder %v4364_v24, 6  ;;  %v1800_v59 = vsub.f32 1.0, %v3183_v55  ;;  %vm2566_vm9 = vcmp.gt.s32.totalorder %v4364_v24, 7  ;;  %v3225_v7 = vld [vmem:[%s4931_s2 + $0x38] sm:$0xff] }
  0x2a   :  { %v3195_v58 = vsel %vm2307_vm8, 1.0, %v4178_v33  ;;  %v3201_v60 = vsel %vm2566_vm9, 1.0, %v4178_v33  ;;  %v2059_v61 = vsub.f32 1.0, %v3189_v56  ;;  %v3127_v8 = vld [vmem:[#allocation7] ss:$0 sm:$0xff] }
  0x2b   :  { %3425 = vmatmul.mubr.msk.f32.vlgmr.msra.gmra.mrb[0].mxu1 %vm97_vm0, %v4345_v16  ;;  %3419 = vmatmul.mubr.msk.f32.vlgmr.msra.gmra.mrb[0].mxu0 %vm97_vm0, %v79_v22  ;;  %v2318_v63 = vsub.f32 1.0, %v3195_v58  ;;  %v2577_v1 = vsub.f32 1.0, %v3201_v60  ;;  %v3136_v24 = vld [vmem:[%s4904_s7] ss:$0 sm:$0xff] }
  0x2c   :  { %3795 = vmatpush3.bf16.msra.mxu1 %v3792_v10  ;;  %3427 = vmatprep.mubr.msk.f32.mxu1 %vm97_vm0, %v4353_v19  ;;  %v3145_v27 = vld [vmem:[%s4905_s8] ss:$0 sm:$0xff] }
  0x2d   :  { %3797 = vmatprep.subr.bf16.mxu1 %v3796_v20  ;;  %3803 = vmatpush3.bf16.msra.mxu0 %v3800_v17 }
  0x2e   :  { %3421 = vmatprep.mubr.msk.f32.mxu0 %vm97_vm0, %v80_v28  ;;  %3805 = vmatprep.subr.bf16.mxu0 %v3804_v23 }
  0x2f   :  { %3428 = vmatmul.mubr.msk.f32.gmra.mrb[2].mxu1 %vm97_vm0, %v4374_v25  ;;  %3422 = vmatmul.mubr.msk.f32.gmra.mrb[2].mxu0 %vm97_vm0, %v81_v29 }
  0x30   :  { %3799 = vmatpush3.bf16.msra.mxu1 %v3796_v20  ;;  %3438 = vmatprep.mubr.msk.f32.mxu1 %vm97_vm0, %v78_v11 }
  0x31   :  { %3808 = vmatprep.subr.bf16.mxu1 %v4179_v35  ;;  %3807 = vmatpush3.bf16.msra.mxu0 %v3804_v23 }
  0x32   :  { %3458 = vmatprep.mubr.msk.f32.mxu0 %vm97_vm0, %v78_v11  ;;  %3820 = vmatprep.subr.bf16.mxu0 %v4179_v35 }
  0x33   :  { %3439 = vmatmul.mubr.msk.f32.vlgmr.msra.gmra.mrb[4].mxu1 %vm97_vm0, %v79_v22  ;;  %767 = vperm.xlu0 %3990, %v764_v43  }
  0x34   :  { %3810 = vmatpush3.bf16.msra.mxu1 %v4400_v32  ;;  %3441 = vmatprep.mubr.msk.f32.mxu1 %vm97_vm0, %v80_v28 }
  0x35   :  { %3811 = vmatprep.subr.bf16.mxu1 %v4179_v35  ;;  %3459 = vmatmul.mubr.msk.f32.vlgmr.msra.gmra.mrb[4].mxu0 %vm97_vm0, %v79_v22 }
  0x36   :  { %3822 = vmatpush3.bf16.msra.mxu0 %v4412_v38  ;;  %3461 = vmatprep.mubr.msk.f32.mxu0 %vm97_vm0, %v80_v28 }
  0x37   :  { %3442 = vmatmul.mubr.msk.f32.gmra.mrb[6].mxu1 %vm97_vm0, %v81_v29  ;;  %3823 = vmatprep.subr.bf16.mxu0 %v4179_v35 }
  0x38   :  { %3444 = vmatprep.mubr.msk.f32.mxu1 %vm97_vm0, %v4316_v6  ;;  %3813 = vmatpush3.bf16.msra.mxu1 %v4423_v41 }
  0x39   :  { %3814 = vmatprep.subr.bf16.mxu1 %v4179_v35  ;;  %3462 = vmatmul.mubr.msk.f32.gmra.mrb[6].mxu0 %vm97_vm0, %v81_v29 }
  0x3a   :  { %3464 = vmatprep.mubr.msk.f32.mxu0 %vm97_vm0, %v4316_v6  ;;  %3825 = vmatpush3.bf16.msra.mxu0 %v4429_v42  ;;  %v3221_v6 = vld [vmem:[%s4931_s2 + $0x28] sm:$0xff] }
  0x3b   :  { %3445 = vmatmul.mubr.msk.f32.gmra.mrb[8].mxu1 %vm97_vm0, %v4345_v16  ;;  %3832 = vmatprep.subr.bf16.mxu0 %v4179_v35 }
  0x3c   :  { %3447 = vmatprep.mubr.msk.f32.mxu1 %vm97_vm0, %v4353_v19  ;;  %1276 = vperm.xlu0 %3990, %v3171_v45  }
  0x3d   :  { %3465 = vmatmul.mubr.msk.f32.gmra.mrb[8].mxu0 %vm97_vm0, %v4345_v16  ;;  %1026 = vperm.xlu1 %3991, %v1023_v46  }
  0x3e   :  { %3467 = vmatprep.mubr.msk.f32.mxu0 %vm97_vm0, %v4353_v19 }
  0x3f   :  { %3448 = vmatmul.mubr.msk.f32.gmra.mrb[10].mxu1 %vm97_vm0, %v4374_v25 }
  0x40   :  { %3478 = vmatprep.mubr.msk.f32.mxu1 %vm4180_vm5, %v4178_v33  ;;  %1535 = vperm.xlu0 %3990, %v3177_v50  }
  0x41   :  { %3468 = vmatmul.mubr.msk.f32.gmra.mrb[10].mxu0 %vm97_vm0, %v4374_v25  ;;  %1285 = vperm.xlu1 %3991, %v1282_v54  }
  0x42   :  { %3500 = vmatprep.mubr.msk.f32.mxu0 %vm4180_vm5, %v4178_v33 }
  0x43   :  { %3479 = vmatmul.mubr.f32.vlgmr.msra.gmra.mrb[12].mxu1 %v4178_v33 }
  0x44   :  { %3816 = vmatpush3.bf16.msra.mxu1 %v4465_v49  ;;  %3489 = vmatprep.mubr.msk.f32.mxu1 %vm4180_vm5, %v4178_v33 }
  0x45   :  { %3817 = vmatprep.subr.bf16.mxu1 %v4179_v35  ;;  %3501 = vmatmul.mubr.f32.vlgmr.msra.gmra.mrb[12].mxu0 %v4178_v33 }
  0x46   :  { %3834 = vmatpush3.bf16.msra.mxu0 %v4465_v49  ;;  %3522 = vmatprep.mubr.msk.f32.mxu0 %vm4180_vm5, %v4178_v33 }
  0x47   :  { %1794 = vperm.xlu0 %3990, %v3183_v55   ;;  %3835 = vmatprep.subr.bf16.mxu0 %v4179_v35 }
  0x48   :  { %3819 = vmatpush3.bf16.msra.mxu1 %v4481_v53  ;;  %1544 = vperm.xlu1 %3991, %v1541_v57  }
  0x49   :  { %3826 = vmatprep.subr.bf16.mxu1 %v4179_v35 }
  0x4a   :  { %3837 = vmatpush3.bf16.msra.mxu0 %v4481_v53 }
  0x4b   :  { %3490 = vmatmul.mubr.f32.vlgmr.msra.gmra.mrb[14].mxu1 %v4178_v33  ;;  %2053 = vperm.xlu0 %3990, %v3189_v56  }
  0x4c   :  { %3828 = vmatpush3.bf16.msra.mxu1 %v4400_v32  ;;  %3511 = vmatprep.mubr.msk.f32.mxu1 %vm4180_vm5, %v4178_v33 }
  0x4d   :  { %3829 = vmatprep.subr.bf16.mxu1 %v4179_v35  ;;  %3844 = vmatprep.subr.bf16.mxu0 %v4179_v35 }
  0x4e   :  { %1803 = vperm.xlu1 %3991, %v1800_v59  }
  0x4f   :  { %2312 = vperm.xlu0 %3990, %v3195_v58  }
  0x50   :  { %3831 = vmatpush3.bf16.msra.mxu1 %v4423_v41 }
  0x51   :  { %3838 = vmatprep.subr.bf16.mxu1 %v4179_v35 }
  0x52   :  { %2062 = vperm.xlu1 %3991, %v2059_v61  }
  0x53   :  { %2571 = vperm.xlu0 %3990, %v3201_v60  }
  0x56   :  { %2321 = vperm.xlu1 %3991, %v2318_v63   ;;  %v4561_v63 = vld [vmem:[%s4909_s12] ss:$0 sm:$0xff] }
  0x57   :  { %2817 = vperm.xlu0 %3990, %v2813_v62  }
  0x5a   :  { %2580 = vperm.xlu1 %3991, %v2577_v1  }
  0x5b   :  { %2871 = vperm.xlu0 %3990, %v3215_v0  }
  0x5e   :  { %2847 = vperm.xlu1 %3991, %v3213_v4  }
  0x5f   :  { %2919 = vperm.xlu0 %3990, %v3219_v2  }
  0x62   :  { %2895 = vperm.xlu1 %3991, %v3217_v5  }
  0x63   :  { %2967 = vperm.xlu0 %3990, %v3223_v3  }
  0x66   :  { %2943 = vperm.xlu1 %3991, %v3221_v6  }
  0x6a   :  { %2991 = vperm.xlu1 %3991, %v3225_v7  }
  0xfe   :  { %v3426_v9 = vpop.f32.mrb[0].mxu1  ;;  %v3420_v10 = vpop.f32.mrb[0].mxu0 }
  0xff   :  { %v214_v11 = vadd.f32 %v3426_v9, %v3127_v8  ;;  %v208_v12 = vpop.f32.mrb[1].mxu1  ;;  %v194_v13 = vadd.f32 %v3420_v10, %v3127_v8  ;;  %v188_v14 = vpop.f32.mrb[1].mxu0 }
 0x100   :  { %v209_v15 = vadd.f32 %v3127_v8, %v208_v12  ;;  %v189_v16 = vadd.f32 %v3127_v8, %v188_v14  ;;  %v4572_v12 = vld [vmem:[%s4910_s13] ss:$0 sm:$0xff] }
 0x101   :  { %232 = vst.msk [vmem:[#allocation2 + $0x28] sm:$0xff] %vm97_vm0, %v214_v11  ;;  %228 = vst.msk [vmem:[#allocation2 + $0x8] sm:$0xff] %vm97_vm0, %v194_v13 }
 0x102   :  { %231 = vst.msk [vmem:[#allocation2 + $0x20] sm:$0xff] %vm97_vm0, %v209_v15  ;;  %v3429_v17 = vpop.f32.mrb[2].mxu1  ;;  %227 = vst.msk [vmem:[#allocation2] sm:$0xff] %vm97_vm0, %v189_v16  ;;  %v3423_v18 = vpop.f32.mrb[2].mxu0 }
 0x103   :  { %v224_v19 = vadd.f32 %v3429_v17, %v3127_v8  ;;  %v218_v20 = vpop.f32.mrb[3].mxu1  ;;  %v204_v21 = vadd.f32 %v3423_v18, %v3127_v8  ;;  %v198_v22 = vpop.f32.mrb[3].mxu0 }
 0x104   :  { %v219_v23 = vadd.f32 %v3127_v8, %v218_v20  ;;  %v199_v25 = vadd.f32 %v3127_v8, %v198_v22 }
 0x105   :  { %234 = vst.msk [vmem:[#allocation2 + $0x38] sm:$0xff] %vm97_vm0, %v224_v19  ;;  %230 = vst.msk [vmem:[#allocation2 + $0x18] sm:$0xff] %vm97_vm0, %v204_v21  ;;  %v4578_v21 = vld [vmem:[%s4911_s14] ss:$0 sm:$0xff] }
 0x106   :  { %233 = vst.msk [vmem:[#allocation2 + $0x30] sm:$0xff] %vm97_vm0, %v219_v23  ;;  %v3440_v26 = vpop.f32.mrb[4].mxu1  ;;  %229 = vst.msk [vmem:[#allocation2 + $0x10] sm:$0xff] %vm97_vm0, %v199_v25 }
 0x107   :  { %v318_v28 = vadd.f32 %v3440_v26, %v3136_v24  ;;  %v312_v29 = vpop.f32.mrb[5].mxu1 }
 0x108   :  { %v313_v30 = vadd.f32 %v3136_v24, %v312_v29  ;;  %v3460_v31 = vpop.f32.mrb[4].mxu0 }
 0x109   :  { %352 = vst.msk [vmem:[#allocation3 + $0x8] sm:$0xff] %vm97_vm0, %v318_v28  ;;  %v442_v34 = vadd.f32 %v3460_v31, %v3145_v27  ;;  %v436_v36 = vpop.f32.mrb[5].mxu0  ;;  %v730_v4 = vld [vmem:[#allocation2] sm:$0xff] }
 0x10a   :  { %351 = vst.msk [vmem:[#allocation3] sm:$0xff] %vm97_vm0, %v313_v30  ;;  %v3443_v37 = vpop.f32.mrb[6].mxu1  ;;  %v437_v39 = vadd.f32 %v3145_v27, %v436_v36  ;;  %v760_v30 = vpop.permute.xlu0 %759 }
 0x10b   :  { %v328_v40 = vadd.f32 %v3443_v37, %v3136_v24  ;;  %v322_v43 = vpop.f32.mrb[7].mxu1  ;;  %476 = vst.msk [vmem:[#allocation4 + $0x8] sm:$0xff] %vm97_vm0, %v442_v34 }
 0x10c   :  { %v323_v44 = vadd.f32 %v3136_v24, %v322_v43  ;;  %475 = vst.msk [vmem:[#allocation4] sm:$0xff] %vm97_vm0, %v437_v39  ;;  %v3463_v45 = vpop.f32.mrb[6].mxu0 }
 0x10d   :  { %354 = vst.msk [vmem:[#allocation3 + $0x18] sm:$0xff] %vm97_vm0, %v328_v40  ;;  %v452_v46 = vadd.f32 %v3463_v45, %v3145_v27  ;;  %v446_v47 = vpop.f32.mrb[7].mxu0 }
 0x10e   :  { %353 = vst.msk [vmem:[#allocation3 + $0x10] sm:$0xff] %vm97_vm0, %v323_v44  ;;  %v3446_v48 = vpop.f32.mrb[8].mxu1  ;;  %v447_v50 = vadd.f32 %v3145_v27, %v446_v47  ;;  %v768_v40 = vpop.permute.xlu0 %767 }
 0x10f   :  { %v338_v51 = vadd.f32 %v3446_v48, %v3136_v24  ;;  %v332_v52 = vpop.f32.mrb[9].mxu1  ;;  %478 = vst.msk [vmem:[#allocation4 + $0x18] sm:$0xff] %vm97_vm0, %v452_v46  ;;  %v770_v43 = vmul.f32 0.0, %v768_v40 }
 0x110   :  { %v333_v54 = vadd.f32 %v3136_v24, %v332_v52  ;;  %477 = vst.msk [vmem:[#allocation4 + $0x10] sm:$0xff] %vm97_vm0, %v447_v50  ;;  %v3466_v55 = vpop.f32.mrb[8].mxu0  ;;  %v986_v52 = vld [vmem:[#allocation2 + $0x8] sm:$0xff] }
 0x111   :  { %356 = vst.msk [vmem:[#allocation3 + $0x28] sm:$0xff] %vm97_vm0, %v338_v51  ;;  %v462_v56 = vadd.f32 %v3466_v55, %v3145_v27  ;;  %v456_v57 = vpop.f32.mrb[9].mxu0  ;;  %v738_v16 = vld [vmem:[#allocation3] sm:$0xff] }
 0x112   :  { %355 = vst.msk [vmem:[#allocation3 + $0x20] sm:$0xff] %vm97_vm0, %v333_v54  ;;  %v3449_v58 = vpop.f32.mrb[10].mxu1  ;;  %v457_v59 = vadd.f32 %v3145_v27, %v456_v57  ;;  %v995_v57 = vld [vmem:[#allocation3 + $0x8] sm:$0xff] }
 0x113   :  { %v348_v60 = vadd.f32 %v3449_v58, %v3136_v24  ;;  %v342_v61 = vpop.f32.mrb[11].mxu1  ;;  %480 = vst.msk [vmem:[#allocation4 + $0x28] sm:$0xff] %vm97_vm0, %v462_v56 }
 0x114   :  { %v343_v62 = vadd.f32 %v3136_v24, %v342_v61  ;;  %479 = vst.msk [vmem:[#allocation4 + $0x20] sm:$0xff] %vm97_vm0, %v457_v59  ;;  %v3469_v0 = vpop.f32.mrb[10].mxu0 }
 0x115   :  { %358 = vst.msk [vmem:[#allocation3 + $0x38] sm:$0xff] %vm97_vm0, %v348_v60  ;;  %v472_v1 = vadd.f32 %v3469_v0, %v3145_v27  ;;  %v466_v2 = vpop.f32.mrb[11].mxu0 }
 0x116   :  { %357 = vst.msk [vmem:[#allocation3 + $0x30] sm:$0xff] %vm97_vm0, %v343_v62  ;;  %v574_v3 = vpop.f32.mrb[12].mxu1  ;;  %v467_v5 = vadd.f32 %v3145_v27, %v466_v2  ;;  %v746_v27 = vld [vmem:[#allocation4] sm:$0xff] }
 0x117   :  { %v575_v6 = vadd.f32 %v4561_v63, %v574_v3  ;;  %v3480_v7 = vpop.f32.mrb[13].mxu1  ;;  %482 = vst.msk [vmem:[#allocation4 + $0x38] sm:$0xff] %vm97_vm0, %v472_v1 }
 0x118   :  { %481 = vst.msk [vmem:[#allocation4 + $0x30] sm:$0xff] %vm97_vm0, %v467_v5  ;;  %v726_v8 = vpop.f32.mrb[12].mxu0 }
 0x119   :  { %v731_v9 = vadd.f32 %v730_v4, %v575_v6  ;;  %v3502_v10 = vpop.f32.mrb[13].mxu0  ;;  %v727_v24 = vadd.f32 %v4578_v21, %v726_v8  ;;  %v1004_v6 = vld [vmem:[#allocation4 + $0x8] sm:$0xff] }
 0x11b   :  { %v3157_v11 = vmul.f32 -1.442695, %v731_v9  ;;  %v1018_v9 = vpop.permute.xlu1 %1017 }
 0x11d   :  { %3992 = vpow2.f32 %v3157_v11 }
 0x11e   :  { %v650_v13 = vpop.f32.mrb[14].mxu1 }
 0x11f   :  { %v651_v14 = vadd.f32 %v4572_v12, %v650_v13  ;;  %v3491_v15 = vpop.f32.mrb[15].mxu1 }
 0x120   :  { %v1027_v15 = vpop.permute.xlu1 %1026 }
 0x121   :  { %v739_v17 = vadd.f32 %v738_v16, %v651_v14 }
 0x123   :  { %v3158_v18 = vmul.f32 -1.442695, %v739_v17 }
 0x125   :  { %3994 = vpow2.f32 %v3158_v18 }
 0x127   :  { %v3993_v19 = vpop.eup %3992 }
 0x128   :  { %v735_v20 = vadd.f32 1.0, %v3993_v19 }
 0x12a   :  { %3996 = vrcp.f32 %v735_v20 }
 0x12f   :  { %v3995_v22 = vpop.eup %3994 }
 0x130   :  { %v743_v23 = vadd.f32 1.0, %v3995_v22 }
 0x132   :  { %3998 = vrcp.f32 %v743_v23 }
 0x134   :  { %v3997_v25 = vpop.eup %3996 }
 0x135   :  { %v747_v26 = vmul.f32 %v3997_v25, %v727_v24 }
 0x137   :  { %v748_v28 = vadd.f32 %v747_v26, %v746_v27  ;;  %v1245_v26 = vld [vmem:[#allocation2 + $0x10] sm:$0xff] }
 0x139   :  { %4000 = vtanh.f32 %v748_v28 }
 0x13c   :  { %v3999_v29 = vpop.eup %3998 }
 0x13d   :  { %v750_v31 = vsub.f32 1.0, %v3999_v29  ;;  %v752_v36 = vmul.f32 0.0, %v3999_v29 }
 0x143   :  { %v4001_v34 = vpop.eup %4000 }
 0x144   :  { %v751_v37 = vmul.f32 %v4001_v34, %v750_v31 }
 0x146   :  { %v753_v39 = vadd.f32 %v752_v36, %v751_v37 }
 0x148   :  { %v762_v44 = vmul.f32 %v760_v30, %v753_v39  ;;  %v1254_v30 = vld [vmem:[#allocation3 + $0x10] sm:$0xff] }
 0x14a   :  { %763 = vst.msk [vmem:[#allocation5] sm:$0xff] %vm97_vm0, %v762_v44  ;;  %v771_v45 = vadd.f32 %v770_v43, %v762_v44 }
 0x14c   :  { %3512 = vmatmul.mubr.msk.f32.vlgmr.msra.gmra.mrb[16].mxu1 %vm97_vm0, %v771_v45  ;;  %3523 = vmatmul.mubr.msk.f32.vlgmr.msra.gmra.mrb[14].mxu0 %vm97_vm0, %v771_v45  ;;  %v1029_v17 = vmul.f32 %v1027_v15, %v771_v45 }
 0x14d   :  { %3840 = vmatpush3.bf16.msra.mxu1 %v4412_v38  ;;  %3533 = vmatprep.mubr.msk.f32.mxu1 %vm4180_vm5, %v4178_v33 }
 0x14e   :  { %3841 = vmatprep.subr.bf16.mxu1 %v4179_v35  ;;  %3846 = vmatpush3.bf16.msra.mxu0 %v4400_v32 }
 0x14f   :  { %3847 = vmatprep.subr.bf16.mxu0 %v4179_v35  ;;  %3544 = vmatprep.mubr.msk.f32.mxu0 %vm4180_vm5, %v4178_v33 }
 0x151   :  { %3843 = vmatpush3.bf16.msra.mxu1 %v4429_v42 }
 0x152   :  { %3850 = vmatprep.subr.bf16.mxu1 %v4179_v35  ;;  %3849 = vmatpush3.bf16.msra.mxu0 %v4423_v41 }
 0x153   :  { %3856 = vmatprep.subr.bf16.mxu0 %v4179_v35 }
 0x154   :  { %3534 = vmatmul.mubr.msk.f32.vlgmr.msra.gmra.mrb[18].mxu1 %vm97_vm0, %v771_v45 }
 0x155   :  { %3852 = vmatpush3.bf16.msra.mxu1 %v4465_v49  ;;  %3555 = vmatprep.mubr.msk.f32.mxu1 %vm4180_vm5, %v4178_v33 }
 0x156   :  { %3853 = vmatprep.subr.bf16.mxu1 %v4179_v35 }
 0x159   :  { %3855 = vmatpush3.bf16.msra.mxu1 %v4481_v53 }
 0x15a   :  { %3862 = vmatprep.subr.bf16.mxu1 %v4179_v35 }
 0x21f   :  { %v841_v46 = vpop.f32.mrb[16].mxu1  ;;  %v911_v47 = vpop.f32.mrb[14].mxu0 }
 0x220   :  { %v842_v48 = vadd.f32 %v4561_v63, %v841_v46  ;;  %v3513_v50 = vpop.f32.mrb[17].mxu1  ;;  %v3524_v51 = vpop.f32.mrb[15].mxu0  ;;  %v912_v54 = vadd.f32 %v4572_v12, %v911_v47 }
 0x222   :  { %v987_v55 = vadd.f32 %v986_v52, %v842_v48  ;;  %v996_v58 = vadd.f32 %v995_v57, %v912_v54  ;;  %v1263_v48 = vld [vmem:[#allocation4 + $0x10] sm:$0xff] }
 0x224   :  { %v3163_v56 = vmul.f32 -1.442695, %v987_v55  ;;  %v3164_v61 = vmul.f32 -1.442695, %v996_v58  ;;  %v1277_v58 = vpop.permute.xlu0 %1276 }
 0x226   :  { %4002 = vpow2.f32 %v3163_v56 }
 0x227   :  { %v981_v59 = vpop.f32.mrb[18].mxu1  ;;  %4004 = vpow2.f32 %v3164_v61 }
 0x228   :  { %v3535_v60 = vpop.f32.mrb[19].mxu1  ;;  %v982_v3 = vadd.f32 %v4578_v21, %v981_v59  ;;  %v1286_v59 = vpop.permute.xlu1 %1285 }
 0x230   :  { %v4003_v62 = vpop.eup %4002 }
 0x231   :  { %v991_v0 = vadd.f32 1.0, %v4003_v62  ;;  %v4005_v1 = vpop.eup %4004 }
 0x232   :  { %v1000_v2 = vadd.f32 1.0, %v4005_v1 }
 0x233   :  { %4006 = vrcp.f32 %v991_v0 }
 0x234   :  { %4008 = vrcp.f32 %v1000_v2 }
 0x23d   :  { %v4007_v4 = vpop.eup %4006 }
 0x23e   :  { %v1005_v5 = vmul.f32 %v4007_v4, %v982_v3  ;;  %v4009_v8 = vpop.eup %4008 }
 0x23f   :  { %v1008_v10 = vsub.f32 1.0, %v4009_v8  ;;  %v1010_v13 = vmul.f32 %v4009_v8, %v771_v45 }
 0x240   :  { %v1006_v7 = vadd.f32 %v1005_v5, %v1004_v6  ;;  %v1504_v5 = vld [vmem:[#allocation2 + $0x18] sm:$0xff] }
 0x242   :  { %4010 = vtanh.f32 %v1006_v7 }
 0x24c   :  { %v4011_v11 = vpop.eup %4010 }
 0x24d   :  { %v1009_v14 = vmul.f32 %v4011_v11, %v1008_v10 }
 0x24f   :  { %v1011_v16 = vadd.f32 %v1010_v13, %v1009_v14 }
 0x251   :  { %v1020_v18 = vmul.f32 %v1018_v9, %v1011_v16  ;;  %v1513_v9 = vld [vmem:[#allocation3 + $0x18] sm:$0xff] }
 0x253   :  { %1022 = vst.msk [vmem:[#allocation5 + $0x8] sm:$0xff] %vm97_vm0, %v1020_v18  ;;  %v1030_v19 = vadd.f32 %v1029_v17, %v1020_v18 }
 0x255   :  { %3545 = vmatmul.mubr.msk.f32.vlgmr.msra.gmra.mrb[16].mxu0 %vm97_vm0, %v1030_v19  ;;  %3556 = vmatmul.mubr.msk.f32.vlgmr.msra.gmra.mrb[20].mxu1 %vm97_vm0, %v1030_v19  ;;  %v1288_v60 = vmul.f32 %v1286_v59, %v1030_v19 }
 0x256   :  { %3858 = vmatpush3.bf16.msra.mxu0 %v4412_v38  ;;  %3566 = vmatprep.mubr.msk.f32.mxu0 %vm4180_vm5, %v4178_v33 }
 0x257   :  { %3859 = vmatprep.subr.bf16.mxu0 %v4179_v35  ;;  %3864 = vmatpush3.bf16.msra.mxu1 %v4400_v32 }
 0x258   :  { %3865 = vmatprep.subr.bf16.mxu1 %v4179_v35  ;;  %3577 = vmatprep.mubr.msk.f32.mxu1 %vm4180_vm5, %v4178_v33 }
 0x25a   :  { %3861 = vmatpush3.bf16.msra.mxu0 %v4429_v42 }
 0x25b   :  { %3868 = vmatprep.subr.bf16.mxu0 %v4179_v35  ;;  %3867 = vmatpush3.bf16.msra.mxu1 %v4423_v41 }
 0x25c   :  { %3874 = vmatprep.subr.bf16.mxu1 %v4179_v35 }
 0x25d   :  { %3567 = vmatmul.mubr.msk.f32.vlgmr.msra.gmra.mrb[18].mxu0 %vm97_vm0, %v1030_v19 }
 0x25e   :  { %3870 = vmatpush3.bf16.msra.mxu0 %v4465_v49  ;;  %3588 = vmatprep.mubr.msk.f32.mxu0 %vm4180_vm5, %v4178_v33 }
 0x25f   :  { %3871 = vmatprep.subr.bf16.mxu0 %v4179_v35 }
 0x262   :  { %3873 = vmatpush3.bf16.msra.mxu0 %v4481_v53 }
 0x263   :  { %3880 = vmatprep.subr.bf16.mxu0 %v4179_v35 }
 0x328   :  { %v1100_v20 = vpop.f32.mrb[16].mxu0  ;;  %v1170_v22 = vpop.f32.mrb[20].mxu1 }
 0x329   :  { %v1101_v23 = vadd.f32 %v4561_v63, %v1100_v20  ;;  %v3546_v24 = vpop.f32.mrb[17].mxu0  ;;  %v3557_v25 = vpop.f32.mrb[21].mxu1  ;;  %v1171_v27 = vadd.f32 %v4572_v12, %v1170_v22 }
 0x32b   :  { %v1246_v28 = vadd.f32 %v1245_v26, %v1101_v23  ;;  %v1255_v31 = vadd.f32 %v1254_v30, %v1171_v27  ;;  %v1522_v23 = vld [vmem:[#allocation4 + $0x18] sm:$0xff] }
 0x32d   :  { %v3169_v29 = vmul.f32 -1.442695, %v1246_v28  ;;  %v3170_v37 = vmul.f32 -1.442695, %v1255_v31  ;;  %v1536_v31 = vpop.permute.xlu0 %1535 }
 0x32f   :  { %4012 = vpow2.f32 %v3169_v29 }
 0x330   :  { %v1240_v34 = vpop.f32.mrb[18].mxu0  ;;  %4014 = vpow2.f32 %v3170_v37 }
 0x331   :  { %v3568_v36 = vpop.f32.mrb[19].mxu0  ;;  %v1241_v45 = vadd.f32 %v4578_v21, %v1240_v34  ;;  %v1545_v34 = vpop.permute.xlu1 %1544 }
 0x339   :  { %v4013_v39 = vpop.eup %4012 }
 0x33a   :  { %v1250_v40 = vadd.f32 1.0, %v4013_v39  ;;  %v4015_v43 = vpop.eup %4014 }
 0x33b   :  { %v1259_v44 = vadd.f32 1.0, %v4015_v43 }
 0x33c   :  { %4016 = vrcp.f32 %v1250_v40 }
 0x33d   :  { %4018 = vrcp.f32 %v1259_v44 }
 0x346   :  { %v4017_v46 = vpop.eup %4016 }
 0x347   :  { %v1264_v47 = vmul.f32 %v4017_v46, %v1241_v45  ;;  %v4019_v51 = vpop.eup %4018 }
 0x348   :  { %v1267_v52 = vsub.f32 1.0, %v4019_v51  ;;  %v1269_v55 = vmul.f32 %v4019_v51, %v1030_v19 }
 0x349   :  { %v1265_v50 = vadd.f32 %v1264_v47, %v1263_v48  ;;  %v1763_v47 = vld [vmem:[#allocation2 + $0x20] sm:$0xff] }
 0x34b   :  { %4020 = vtanh.f32 %v1265_v50 }
 0x355   :  { %v4021_v54 = vpop.eup %4020 }
 0x356   :  { %v1268_v56 = vmul.f32 %v4021_v54, %v1267_v52  ;;  %v1772_v52 = vld [vmem:[#allocation3 + $0x20] sm:$0xff] }
 0x358   :  { %v1270_v57 = vadd.f32 %v1269_v55, %v1268_v56 }
 0x35a   :  { %v1279_v61 = vmul.f32 %v1277_v58, %v1270_v57 }
 0x35c   :  { %1281 = vst.msk [vmem:[#allocation5 + $0x10] sm:$0xff] %vm97_vm0, %v1279_v61  ;;  %v1289_v62 = vadd.f32 %v1288_v60, %v1279_v61 }
 0x35e   :  { %3578 = vmatmul.mubr.msk.f32.vlgmr.msra.gmra.mrb[22].mxu1 %vm97_vm0, %v1289_v62  ;;  %3589 = vmatmul.mubr.msk.f32.vlgmr.msra.gmra.mrb[20].mxu0 %vm97_vm0, %v1289_v62  ;;  %v1547_v37 = vmul.f32 %v1545_v34, %v1289_v62 }
 0x35f   :  { %3876 = vmatpush3.bf16.msra.mxu1 %v4412_v38  ;;  %3599 = vmatprep.mubr.msk.f32.mxu1 %vm4180_vm5, %v4178_v33 }
 0x360   :  { %3877 = vmatprep.subr.bf16.mxu1 %v4179_v35  ;;  %3882 = vmatpush3.bf16.msra.mxu0 %v4400_v32 }
 0x361   :  { %3883 = vmatprep.subr.bf16.mxu0 %v4179_v35  ;;  %3610 = vmatprep.mubr.msk.f32.mxu0 %vm4180_vm5, %v4178_v33 }
 0x363   :  { %3879 = vmatpush3.bf16.msra.mxu1 %v4429_v42 }
 0x364   :  { %3886 = vmatprep.subr.bf16.mxu1 %v4179_v35  ;;  %3885 = vmatpush3.bf16.msra.mxu0 %v4423_v41 }
 0x365   :  { %3892 = vmatprep.subr.bf16.mxu0 %v4179_v35 }
 0x366   :  { %3600 = vmatmul.mubr.msk.f32.vlgmr.msra.gmra.mrb[24].mxu1 %vm97_vm0, %v1289_v62 }
 0x367   :  { %3888 = vmatpush3.bf16.msra.mxu1 %v4465_v49  ;;  %3621 = vmatprep.mubr.msk.f32.mxu1 %vm4180_vm5, %v4178_v33 }
 0x368   :  { %3889 = vmatprep.subr.bf16.mxu1 %v4179_v35 }
 0x36b   :  { %3891 = vmatpush3.bf16.msra.mxu1 %v4481_v53 }
 0x36c   :  { %3898 = vmatprep.subr.bf16.mxu1 %v4179_v35 }
 0x431   :  { %v1359_v0 = vpop.f32.mrb[22].mxu1  ;;  %v1429_v1 = vpop.f32.mrb[20].mxu0 }
 0x432   :  { %v1360_v2 = vadd.f32 %v4561_v63, %v1359_v0  ;;  %v3579_v3 = vpop.f32.mrb[23].mxu1  ;;  %v3590_v4 = vpop.f32.mrb[21].mxu0  ;;  %v1430_v6 = vadd.f32 %v4572_v12, %v1429_v1 }
 0x434   :  { %v1505_v7 = vadd.f32 %v1504_v5, %v1360_v2  ;;  %v1514_v10 = vadd.f32 %v1513_v9, %v1430_v6  ;;  %v1781_v2 = vld [vmem:[#allocation4 + $0x20] sm:$0xff] }
 0x436   :  { %v3175_v8 = vmul.f32 -1.442695, %v1505_v7  ;;  %v3176_v14 = vmul.f32 -1.442695, %v1514_v10  ;;  %v1795_v10 = vpop.permute.xlu0 %1794 }
 0x438   :  { %4022 = vpow2.f32 %v3175_v8 }
 0x439   :  { %v1499_v11 = vpop.f32.mrb[24].mxu1  ;;  %4024 = vpow2.f32 %v3176_v14 }
 0x43a   :  { %v3601_v13 = vpop.f32.mrb[25].mxu1  ;;  %v1500_v19 = vadd.f32 %v4578_v21, %v1499_v11  ;;  %v1804_v11 = vpop.permute.xlu1 %1803 }
 0x442   :  { %v4023_v15 = vpop.eup %4022 }
 0x443   :  { %v1509_v16 = vadd.f32 1.0, %v4023_v15  ;;  %v4025_v17 = vpop.eup %4024 }
 0x444   :  { %v1518_v18 = vadd.f32 1.0, %v4025_v17 }
 0x445   :  { %4026 = vrcp.f32 %v1509_v16 }
 0x446   :  { %4028 = vrcp.f32 %v1518_v18 }
 0x44f   :  { %v4027_v20 = vpop.eup %4026 }
 0x450   :  { %v1523_v22 = vmul.f32 %v4027_v20, %v1500_v19  ;;  %v4029_v25 = vpop.eup %4028 }
 0x451   :  { %v1526_v26 = vsub.f32 1.0, %v4029_v25  ;;  %v1528_v28 = vmul.f32 %v4029_v25, %v1289_v62 }
 0x452   :  { %v1524_v24 = vadd.f32 %v1523_v22, %v1522_v23  ;;  %v2022_v22 = vld [vmem:[#allocation2 + $0x28] sm:$0xff] }
 0x454   :  { %4030 = vtanh.f32 %v1524_v24 }
 0x45e   :  { %v4031_v27 = vpop.eup %4030 }
 0x45f   :  { %v1527_v29 = vmul.f32 %v4031_v27, %v1526_v26  ;;  %v2031_v26 = vld [vmem:[#allocation3 + $0x28] sm:$0xff] }
 0x461   :  { %v1529_v30 = vadd.f32 %v1528_v28, %v1527_v29 }
 0x463   :  { %v1538_v36 = vmul.f32 %v1536_v31, %v1529_v30 }
 0x465   :  { %1540 = vst.msk [vmem:[#allocation5 + $0x18] sm:$0xff] %vm97_vm0, %v1538_v36  ;;  %v1548_v39 = vadd.f32 %v1547_v37, %v1538_v36 }
 0x467   :  { %3611 = vmatmul.mubr.msk.f32.vlgmr.msra.gmra.mrb[22].mxu0 %vm97_vm0, %v1548_v39  ;;  %3622 = vmatmul.mubr.msk.f32.vlgmr.msra.gmra.mrb[26].mxu1 %vm97_vm0, %v1548_v39  ;;  %v1806_v14 = vmul.f32 %v1804_v11, %v1548_v39 }
 0x468   :  { %3894 = vmatpush3.bf16.msra.mxu0 %v4412_v38  ;;  %3632 = vmatprep.mubr.msk.f32.mxu0 %vm4180_vm5, %v4178_v33 }
 0x469   :  { %3895 = vmatprep.subr.bf16.mxu0 %v4179_v35  ;;  %3900 = vmatpush3.bf16.msra.mxu1 %v4400_v32 }
 0x46a   :  { %3901 = vmatprep.subr.bf16.mxu1 %v4179_v35  ;;  %3643 = vmatprep.mubr.msk.f32.mxu1 %vm4180_vm5, %v4178_v33 }
 0x46c   :  { %3897 = vmatpush3.bf16.msra.mxu0 %v4429_v42 }
 0x46d   :  { %3904 = vmatprep.subr.bf16.mxu0 %v4179_v35  ;;  %3903 = vmatpush3.bf16.msra.mxu1 %v4423_v41 }
 0x46e   :  { %3910 = vmatprep.subr.bf16.mxu1 %v4179_v35 }
 0x46f   :  { %3633 = vmatmul.mubr.msk.f32.vlgmr.msra.gmra.mrb[24].mxu0 %vm97_vm0, %v1548_v39 }
 0x470   :  { %3906 = vmatpush3.bf16.msra.mxu0 %v4465_v49  ;;  %3654 = vmatprep.mubr.msk.f32.mxu0 %vm4180_vm5, %v4178_v33 }
 0x471   :  { %3907 = vmatprep.subr.bf16.mxu0 %v4179_v35 }
 0x474   :  { %3909 = vmatpush3.bf16.msra.mxu0 %v4481_v53 }
 0x475   :  { %3916 = vmatprep.subr.bf16.mxu0 %v4179_v35 }
 0x53a   :  { %v1618_v40 = vpop.f32.mrb[22].mxu0  ;;  %v1688_v43 = vpop.f32.mrb[26].mxu1 }
 0x53b   :  { %v1619_v44 = vadd.f32 %v4561_v63, %v1618_v40  ;;  %v3612_v45 = vpop.f32.mrb[23].mxu0  ;;  %v3623_v46 = vpop.f32.mrb[27].mxu1  ;;  %v1689_v48 = vadd.f32 %v4572_v12, %v1688_v43 }
 0x53d   :  { %v1764_v50 = vadd.f32 %v1763_v47, %v1619_v44  ;;  %v1773_v54 = vadd.f32 %v1772_v52, %v1689_v48  ;;  %v2040_v44 = vld [vmem:[#allocation4 + $0x28] sm:$0xff] }
 0x53f   :  { %v3181_v51 = vmul.f32 -1.442695, %v1764_v50  ;;  %v3182_v57 = vmul.f32 -1.442695, %v1773_v54  ;;  %v2054_v54 = vpop.permute.xlu0 %2053 }
 0x541   :  { %4032 = vpow2.f32 %v3181_v51 }
 0x542   :  { %v1758_v55 = vpop.f32.mrb[24].mxu0  ;;  %4034 = vpow2.f32 %v3182_v57 }
 0x543   :  { %v3634_v56 = vpop.f32.mrb[25].mxu0  ;;  %v1759_v62 = vadd.f32 %v4578_v21, %v1758_v55  ;;  %v2063_v55 = vpop.permute.xlu1 %2062 }
 0x54b   :  { %v4033_v58 = vpop.eup %4032 }
 0x54c   :  { %v1768_v59 = vadd.f32 1.0, %v4033_v58  ;;  %v4035_v60 = vpop.eup %4034 }
 0x54d   :  { %v1777_v61 = vadd.f32 1.0, %v4035_v60 }
 0x54e   :  { %4036 = vrcp.f32 %v1768_v59 }
 0x54f   :  { %4038 = vrcp.f32 %v1777_v61 }
 0x558   :  { %v4037_v0 = vpop.eup %4036 }
 0x559   :  { %v1782_v1 = vmul.f32 %v4037_v0, %v1759_v62  ;;  %v4039_v4 = vpop.eup %4038 }
 0x55a   :  { %v1785_v5 = vsub.f32 1.0, %v4039_v4  ;;  %v1787_v7 = vmul.f32 %v4039_v4, %v1548_v39  ;;  %v2290_v4 = vld [vmem:[#allocation3 + $0x30] sm:$0xff] }
 0x55b   :  { %v1783_v3 = vadd.f32 %v1782_v1, %v1781_v2  ;;  %v2281_v1 = vld [vmem:[#allocation2 + $0x30] sm:$0xff] }
 0x55d   :  { %4040 = vtanh.f32 %v1783_v3 }
 0x567   :  { %v4041_v6 = vpop.eup %4040 }
 0x568   :  { %v1786_v8 = vmul.f32 %v4041_v6, %v1785_v5 }
 0x56a   :  { %v1788_v9 = vadd.f32 %v1787_v7, %v1786_v8 }
 0x56c   :  { %v1797_v13 = vmul.f32 %v1795_v10, %v1788_v9 }
 0x56e   :  { %1799 = vst.msk [vmem:[#allocation5 + $0x20] sm:$0xff] %vm97_vm0, %v1797_v13  ;;  %v1807_v15 = vadd.f32 %v1806_v14, %v1797_v13 }
 0x570   :  { %3644 = vmatmul.mubr.msk.f32.vlgmr.msra.gmra.mrb[28].mxu1 %vm97_vm0, %v1807_v15  ;;  %3655 = vmatmul.mubr.msk.f32.vlgmr.msra.gmra.mrb[26].mxu0 %vm97_vm0, %v1807_v15  ;;  %v2065_v57 = vmul.f32 %v2063_v55, %v1807_v15 }
 0x571   :  { %3912 = vmatpush3.bf16.msra.mxu1 %v4412_v38  ;;  %3665 = vmatprep.mubr.msk.f32.mxu1 %vm4180_vm5, %v4178_v33 }
 0x572   :  { %3913 = vmatprep.subr.bf16.mxu1 %v4179_v35  ;;  %3918 = vmatpush3.bf16.msra.mxu0 %v4400_v32 }
 0x573   :  { %3919 = vmatprep.subr.bf16.mxu0 %v4179_v35  ;;  %3676 = vmatprep.mubr.msk.f32.mxu0 %vm4180_vm5, %v4178_v33 }
 0x575   :  { %3915 = vmatpush3.bf16.msra.mxu1 %v4429_v42 }
 0x576   :  { %3922 = vmatprep.subr.bf16.mxu1 %v4179_v35  ;;  %3921 = vmatpush3.bf16.msra.mxu0 %v4423_v41 }
 0x577   :  { %3928 = vmatprep.subr.bf16.mxu0 %v4179_v35 }
 0x578   :  { %3666 = vmatmul.mubr.msk.f32.vlgmr.msra.gmra.mrb[30].mxu1 %vm97_vm0, %v1807_v15 }
 0x579   :  { %3924 = vmatpush3.bf16.msra.mxu1 %v4465_v49  ;;  %3687 = vmatprep.mubr.msk.f32.mxu1 %vm4180_vm5, %v4178_v33 }
 0x57a   :  { %3925 = vmatprep.subr.bf16.mxu1 %v4179_v35 }
 0x57d   :  { %3927 = vmatpush3.bf16.msra.mxu1 %v4481_v53 }
 0x57e   :  { %3934 = vmatprep.subr.bf16.mxu1 %v4179_v35 }
 0x643   :  { %v1877_v16 = vpop.f32.mrb[28].mxu1  ;;  %v1947_v17 = vpop.f32.mrb[26].mxu0 }
 0x644   :  { %v1878_v18 = vadd.f32 %v4561_v63, %v1877_v16  ;;  %v3645_v19 = vpop.f32.mrb[29].mxu1  ;;  %v3656_v20 = vpop.f32.mrb[27].mxu0  ;;  %v1948_v23 = vadd.f32 %v4572_v12, %v1947_v17  ;;  %v2299_v17 = vld [vmem:[#allocation4 + $0x30] sm:$0xff] }
 0x646   :  { %v2023_v24 = vadd.f32 %v2022_v22, %v1878_v18  ;;  %v2032_v27 = vadd.f32 %v2031_v26, %v1948_v23  ;;  %v2313_v26 = vpop.permute.xlu0 %2312 }
 0x648   :  { %v3187_v25 = vmul.f32 -1.442695, %v2023_v24  ;;  %v3188_v30 = vmul.f32 -1.442695, %v2032_v27  ;;  %v2322_v27 = vpop.permute.xlu1 %2321 }
 0x64a   :  { %4042 = vpow2.f32 %v3187_v25 }
 0x64b   :  { %v2017_v28 = vpop.f32.mrb[30].mxu1  ;;  %4044 = vpow2.f32 %v3188_v30  ;;  %v2595_v30 = vld [vmem:[%s4912_s15 + $0x10] sm:$0xff] }
 0x64c   :  { %v3667_v29 = vpop.f32.mrb[31].mxu1  ;;  %v2018_v39 = vadd.f32 %v4578_v21, %v2017_v28 }
 0x654   :  { %v4043_v31 = vpop.eup %4042 }
 0x655   :  { %v2027_v34 = vadd.f32 1.0, %v4043_v31  ;;  %v4045_v36 = vpop.eup %4044  ;;  %v2596_v31 = vld [vmem:[%s4912_s15 + $0x18] sm:$0xff] }
 0x656   :  { %v2036_v37 = vadd.f32 1.0, %v4045_v36  ;;  %v3956_v36 = vpack.c.bf16 %v2596_v31, %v2595_v30 }
 0x657   :  { %4046 = vrcp.f32 %v2027_v34 }
 0x658   :  { %4048 = vrcp.f32 %v2036_v37  ;;  %v4750_v37 = vld [vmem:[#allocation5] sm:$0xff] }
 0x661   :  { %v4047_v40 = vpop.eup %4046 }
 0x662   :  { %v2041_v43 = vmul.f32 %v4047_v40, %v2018_v39  ;;  %v4049_v46 = vpop.eup %4048  ;;  %v4766_v39 = vld [vmem:[#allocation5 + $0x10] sm:$0xff]  ;;  %v4776_v40 = vld [vmem:[#allocation5 + $0x20] sm:$0xff] }
 0x663   :  { %v2044_v47 = vsub.f32 1.0, %v4049_v46  ;;  %v2046_v50 = vmul.f32 %v4049_v46, %v1807_v15  ;;  %v2735_v46 = vld [vmem:[%s4913_s16 + $0x8] sm:$0xff] }
 0x664   :  { %v2042_v45 = vadd.f32 %v2041_v43, %v2040_v44 }
 0x666   :  { %4050 = vtanh.f32 %v2042_v45  ;;  %v2734_v45 = vld [vmem:[%s4913_s16] sm:$0xff] }
 0x670   :  { %v4051_v48 = vpop.eup %4050 }
 0x671   :  { %v2045_v51 = vmul.f32 %v4051_v48, %v2044_v47  ;;  %v3961_v47 = vpack.c.bf16 %v2735_v46, %v2734_v45  ;;  %v2736_v48 = vld [vmem:[%s4913_s16 + $0x10] sm:$0xff] }
 0x673   :  { %v2047_v52 = vadd.f32 %v2046_v50, %v2045_v51  ;;  %v2737_v50 = vld [vmem:[%s4913_s16 + $0x18] sm:$0xff] }
 0x674   :  { %v3964_v51 = vpack.c.bf16 %v2737_v50, %v2736_v48 }
 0x675   :  { %v2056_v56 = vmul.f32 %v2054_v54, %v2047_v52 }
 0x677   :  { %2058 = vst.msk [vmem:[#allocation5 + $0x28] sm:$0xff] %vm97_vm0, %v2056_v56  ;;  %v2066_v58 = vadd.f32 %v2065_v57, %v2056_v56 }
 0x679   :  { %3677 = vmatmul.mubr.msk.f32.vlgmr.msra.gmra.mrb[28].mxu0 %vm97_vm0, %v2066_v58  ;;  %3688 = vmatmul.mubr.msk.f32.vlgmr.msra.gmra.mrb[32].mxu1 %vm97_vm0, %v2066_v58  ;;  %v2324_v29 = vmul.f32 %v2322_v27, %v2066_v58 }
 0x67a   :  { %3930 = vmatpush3.bf16.msra.mxu0 %v4412_v38  ;;  %3698 = vmatprep.mubr.msk.f32.mxu0 %vm4180_vm5, %v4178_v33 }
 0x67b   :  { %3931 = vmatprep.subr.bf16.mxu0 %v4179_v35  ;;  %3936 = vmatpush3.bf16.msra.mxu1 %v4400_v32  ;;  %v2593_v32 = vld [vmem:[%s4912_s15] sm:$0xff] }
 0x67c   :  { %3937 = vmatprep.subr.bf16.mxu1 %v4179_v35  ;;  %3709 = vmatprep.mubr.msk.f32.mxu1 %vm4180_vm5, %v4178_v33 }
 0x67e   :  { %3933 = vmatpush3.bf16.msra.mxu0 %v4429_v42  ;;  %v4780_v43 = vld [vmem:[#allocation5 + $0x28] sm:$0xff] }
 0x67f   :  { %3940 = vmatprep.subr.bf16.mxu0 %v4179_v35  ;;  %3939 = vmatpush3.bf16.msra.mxu1 %v4423_v41  ;;  %v2594_v41 = vld [vmem:[%s4912_s15 + $0x8] sm:$0xff] }
 0x680   :  { %3946 = vmatprep.subr.bf16.mxu1 %v4179_v35  ;;  %v3952_v59 = vpack.c.bf16 %v2594_v41, %v2593_v32 }
 0x681   :  { %3699 = vmatmul.mubr.msk.f32.vlgmr.msra.gmra.mrb[30].mxu0 %vm97_vm0, %v2066_v58 }
 0x682   :  { %3942 = vmatpush3.bf16.msra.mxu0 %v4465_v49  ;;  %3720 = vmatprep.mubr.msk.f32.mxu0 %vm4180_vm5, %v4178_v33 }
 0x683   :  { %3943 = vmatprep.subr.bf16.mxu0 %v4179_v35 }
 0x686   :  { %3945 = vmatpush3.bf16.msra.mxu0 %v4481_v53 }
 0x687   :  { %3953 = vmatprep.subr.bf16.mxu0 %v3952_v59 }
 0x74c   :  { %v2136_v60 = vpop.f32.mrb[28].mxu0  ;;  %v2206_v61 = vpop.f32.mrb[32].mxu1 }
 0x74d   :  { %v2137_v49 = vadd.f32 %v4561_v63, %v2136_v60  ;;  %v3678_v62 = vpop.f32.mrb[29].mxu0  ;;  %v3689_v0 = vpop.f32.mrb[33].mxu1  ;;  %v2207_v2 = vadd.f32 %v4572_v12, %v2206_v61  ;;  %v2549_v60 = vld [vmem:[#allocation3 + $0x38] sm:$0xff] }
 0x74f   :  { %v2282_v53 = vadd.f32 %v2281_v1, %v2137_v49  ;;  %v2291_v5 = vadd.f32 %v2290_v4, %v2207_v2 }
 0x751   :  { %v3193_v3 = vmul.f32 -1.442695, %v2282_v53  ;;  %v3194_v8 = vmul.f32 -1.442695, %v2291_v5 }
 0x753   :  { %4052 = vpow2.f32 %v3193_v3 }
 0x754   :  { %v2276_v6 = vpop.f32.mrb[30].mxu0  ;;  %4054 = vpow2.f32 %v3194_v8 }
 0x755   :  { %v3700_v7 = vpop.f32.mrb[31].mxu0  ;;  %v2277_v14 = vadd.f32 %v4578_v21, %v2276_v6 }
 0x75d   :  { %v4053_v9 = vpop.eup %4052 }
 0x75e   :  { %v2286_v10 = vadd.f32 1.0, %v4053_v9  ;;  %v4055_v11 = vpop.eup %4054 }
 0x75f   :  { %v2295_v13 = vadd.f32 1.0, %v4055_v11  ;;  %v2558_v11 = vld [vmem:[#allocation4 + $0x38] sm:$0xff] }
 0x760   :  { %4056 = vrcp.f32 %v2286_v10 }
 0x761   :  { %4058 = vrcp.f32 %v2295_v13 }
 0x76a   :  { %v4057_v15 = vpop.eup %4056 }
 0x76b   :  { %v2300_v16 = vmul.f32 %v4057_v15, %v2277_v14  ;;  %v4059_v19 = vpop.eup %4058 }
 0x76c   :  { %v2303_v20 = vsub.f32 1.0, %v4059_v19  ;;  %v2305_v23 = vmul.f32 %v4059_v19, %v2066_v58  ;;  %v2540_v58 = vld [vmem:[#allocation2 + $0x38] sm:$0xff] }
 0x76d   :  { %v2301_v18 = vadd.f32 %v2300_v16, %v2299_v17 }
 0x76f   :  { %4060 = vtanh.f32 %v2301_v18 }
 0x779   :  { %v4061_v22 = vpop.eup %4060 }
 0x77a   :  { %v2304_v24 = vmul.f32 %v4061_v22, %v2303_v20  ;;  %v2572_v20 = vpop.permute.xlu0 %2571  ;;  %v2581_v22 = vpop.permute.xlu1 %2580 }
 0x77c   :  { %v2306_v25 = vadd.f32 %v2305_v23, %v2304_v24 }
 0x77e   :  { %v2315_v28 = vmul.f32 %v2313_v26, %v2306_v25  ;;  %v2818_v26 = vpop.permute.xlu0 %2817  ;;  %v2848_v27 = vpop.permute.xlu1 %2847 }
 0x780   :  { %2317 = vst.msk [vmem:[#allocation5 + $0x30] sm:$0xff] %vm97_vm0, %v2315_v28  ;;  %v4743_v34 = vadd.f32 %v2324_v29, %v2315_v28 }
 0x782   :  { %3710 = vmatmul.mubr.msk.f32.vlgmr.msra.gmra.mrb[34].mxu1 %vm97_vm0, %v4743_v34  ;;  %3721 = vmatmul.mubr.msk.f32.vlgmr.msra.gmra.mrb[32].mxu0 %vm97_vm0, %v4743_v34  ;;  %v2583_v24 = vmul.f32 %v2581_v22, %v4743_v34  ;;  %v2872_v28 = vpop.permute.xlu0 %2871  ;;  %v2896_v29 = vpop.permute.xlu1 %2895 }
 0x783   :  { %3948 = vmatpush3.bf16.msra.mxu1 %v4412_v38  ;;  %3955 = vmatpush3.bf16.msra.mxu0 %v3952_v59  ;;  %v4760_v38 = vld [vmem:[#allocation5 + $0x8] sm:$0xff] }
 0x784   :  { %3742 = vmatprep.mubr.msk.f32.mxu0 %vm97_vm0, %v4750_v37  ;;  %3949 = vmatprep.subr.bf16.mxu1 %v4179_v35 }
 0x785   :  { %3957 = vmatprep.subr.bf16.mxu0 %v3956_v36  ;;  %3731 = vmatprep.mubr.msk.f32.mxu1 %vm4180_vm5, %v4178_v33 }
 0x786   :  { %v2920_v30 = vpop.permute.xlu0 %2919 }
 0x787   :  { %3951 = vmatpush3.bf16.msra.mxu1 %v4429_v42  ;;  %3959 = vmatpush3.bf16.msra.mxu0 %v3956_v36  ;;  %v4772_v42 = vld [vmem:[#allocation5 + $0x18] sm:$0xff]  ;;  %v4784_v44 = vld [vmem:[#allocation5 + $0x30] sm:$0xff] }
 0x788   :  { %3960 = vmatprep.subr.bf16.mxu1 %v4179_v35  ;;  %3966 = vmatprep.subr.bf16.mxu0 %v4179_v35 }
 0x78a   :  { %3732 = vmatmul.mubr.msk.f32.vlgmr.msra.gmra.mrb[36].mxu1 %vm97_vm0, %v4743_v34  ;;  %3743 = vmatmul.mubr.msk.f32.vlgmr.msra.gmra.mrb[34].mxu0 %vm97_vm0, %v4760_v38 }
 0x78b   :  { %3745 = vmatprep.mubr.msk.f32.mxu0 %vm97_vm0, %v4766_v39  ;;  %3762 = vmatprep.mubr.msk.f32.mxu1 %vm4180_vm5, %v4178_v33 }
 0x78c   :  { %3962 = vmatpush3.bf16.msra.mxu1 %v3961_v47 }
 0x78d   :  { %3963 = vmatprep.subr.bf16.mxu1 %v4179_v35 }
 0x78e   :  { %3746 = vmatmul.mubr.msk.f32.gmra.mrb[36].mxu0 %vm97_vm0, %v4772_v42 }
 0x78f   :  { %3748 = vmatprep.mubr.msk.f32.mxu0 %vm97_vm0, %v4776_v40 }
 0x790   :  { %3965 = vmatpush3.bf16.msra.mxu1 %v3964_v51 }
 0x792   :  { %3749 = vmatmul.mubr.msk.f32.gmra.mrb[38].mxu0 %vm97_vm0, %v4780_v43 }
 0x793   :  { %3751 = vmatprep.mubr.msk.f32.mxu0 %vm97_vm0, %v4784_v44 }
 0x855   :  { %v2395_v52 = vpop.f32.mrb[34].mxu1  ;;  %v2465_v54 = vpop.f32.mrb[32].mxu0 }
 0x856   :  { %v2396_v55 = vadd.f32 %v4561_v63, %v2395_v52  ;;  %v3711_v56 = vpop.f32.mrb[35].mxu1  ;;  %v3722_v57 = vpop.f32.mrb[33].mxu0  ;;  %v2466_v32 = vadd.f32 %v4572_v12, %v2465_v54 }
 0x858   :  { %v2541_v41 = vadd.f32 %v2540_v58, %v2396_v55  ;;  %v2550_v61 = vadd.f32 %v2549_v60, %v2466_v32 }
 0x85a   :  { %v3199_v59 = vmul.f32 -1.442695, %v2541_v41  ;;  %v3200_v2 = vmul.f32 -1.442695, %v2550_v61 }
 0x85c   :  { %4062 = vpow2.f32 %v3199_v59 }
 0x85d   :  { %v2535_v49 = vpop.f32.mrb[36].mxu1  ;;  %v3744_v62 = vpop.f32.mrb[34].mxu0  ;;  %4064 = vpow2.f32 %v3200_v2 }
 0x85e   :  { %2727 = vst.msk [vmem:[#allocation6 + $0x8] sm:$0xff] %vm97_vm0, %v3744_v62  ;;  %v3733_v0 = vpop.f32.mrb[37].mxu1  ;;  %v2687_v1 = vpop.f32.mrb[35].mxu0  ;;  %v2536_v8 = vadd.f32 %v4578_v21, %v2535_v49 }
 0x85f   :  { %2726 = vst.msk [vmem:[#allocation6] sm:$0xff] %vm97_vm0, %v2687_v1 }
 0x861   :  { %v3747_v63 = vpop.f32.mrb[36].mxu0 }
 0x862   :  { %2729 = vst.msk [vmem:[#allocation6 + $0x18] sm:$0xff] %vm97_vm0, %v3747_v63  ;;  %v2697_v53 = vpop.f32.mrb[37].mxu0 }
 0x863   :  { %2728 = vst.msk [vmem:[#allocation6 + $0x10] sm:$0xff] %vm97_vm0, %v2697_v53 }
 0x865   :  { %v3750_v12 = vpop.f32.mrb[38].mxu0  ;;  %v2844_v45 = vld [vmem:[#allocation6 + $0x8] sm:$0xff] }
 0x866   :  { %v4063_v3 = vpop.eup %4062  ;;  %2731 = vst.msk [vmem:[#allocation6 + $0x28] sm:$0xff] %vm97_vm0, %v3750_v12  ;;  %v2707_v4 = vpop.f32.mrb[39].mxu0  ;;  %v2814_v51 = vld [vmem:[#allocation6] sm:$0xff] }
 0x867   :  { %v2545_v5 = vadd.f32 1.0, %v4063_v3  ;;  %2730 = vst.msk [vmem:[#allocation6 + $0x20] sm:$0xff] %vm97_vm0, %v2707_v4  ;;  %v4065_v6 = vpop.eup %4064 }
 0x868   :  { %v2554_v7 = vadd.f32 1.0, %v4065_v6  ;;  %v2968_v6 = vpop.permute.xlu0 %2967 }
 0x869   :  { %4066 = vrcp.f32 %v2545_v5  ;;  %v2892_v41 = vld [vmem:[#allocation6 + $0x18] sm:$0xff] }
 0x86a   :  { %4068 = vrcp.f32 %v2554_v7  ;;  %v2868_v52 = vld [vmem:[#allocation6 + $0x10] sm:$0xff] }
 0x86d   :  { %v2940_v59 = vld [vmem:[#allocation6 + $0x28] sm:$0xff] }
 0x86e   :  { %v2916_v54 = vld [vmem:[#allocation6 + $0x20] sm:$0xff] }
 0x873   :  { %v4067_v9 = vpop.eup %4066 }
 0x874   :  { %v2559_v10 = vmul.f32 %v4067_v9, %v2536_v8  ;;  %v4069_v14 = vpop.eup %4068 }
 0x875   :  { %v2562_v15 = vsub.f32 1.0, %v4069_v14  ;;  %v2564_v17 = vmul.f32 %v4069_v14, %v4743_v34  ;;  %v2944_v34 = vpop.permute.xlu1 %2943 }
 0x876   :  { %v2560_v13 = vadd.f32 %v2559_v10, %v2558_v11 }
 0x878   :  { %4070 = vtanh.f32 %v2560_v13 }
 0x879   :  { %v2992_v3 = vpop.permute.xlu1 %2991 }
 0x882   :  { %v4071_v16 = vpop.eup %4070 }
 0x883   :  { %v2563_v18 = vmul.f32 %v4071_v16, %v2562_v15 }
 0x885   :  { %v2565_v19 = vadd.f32 %v2564_v17, %v2563_v18 }
 0x887   :  { %v2574_v23 = vmul.f32 %v2572_v20, %v2565_v19 }
 0x889   :  { %2576 = vst.msk [vmem:[#allocation5 + $0x38] sm:$0xff] %vm97_vm0, %v2574_v23  ;;  %v4813_v21 = vadd.f32 %v2583_v24, %v2574_v23 }
 0x88b   :  { %3763 = vmatmul.mubr.msk.f32.vlgmr.msra.gmra.mrb[38].mxu1 %vm97_vm0, %v4813_v21 }
 0x890   :  { %v4817_v25 = vld [vmem:[#allocation5 + $0x38] sm:$0xff] }
 0x891   :  { %3752 = vmatmul.mubr.msk.f32.gmra.mrb[40].mxu0 %vm97_vm0, %v4817_v25 }
 0x892   :  { %3781 = vmatprep.mubr.msk.f32.mxu0 %vm4180_vm5, %v4178_v33 }
 0x95e   :  { %v2807_v31 = vpop.f32.mrb[38].mxu1 }
 0x95f   :  { %v3764_v36 = vpop.f32.mrb[39].mxu1  ;;  %v2850_v46 = vmul.f32 %v2848_v27, %v2807_v31  ;;  %v2820_v47 = vmul.f32 %v2818_v26, %v2807_v31  ;;  %v2874_v48 = vmul.f32 %v2872_v28, %v2807_v31  ;;  %v2922_v50 = vmul.f32 %v2920_v30, %v2807_v31  ;;  %v3212_v28 = vld [vmem:[%s4914_s17] ss:$0 sm:$0xff] }
 0x960   :  { %v2898_v55 = vmul.f32 %v2896_v29, %v2807_v31  ;;  %v2946_v56 = vmul.f32 %v2944_v34, %v2807_v31  ;;  %v2994_v4 = vmul.f32 %v2992_v3, %v2807_v31  ;;  %v2970_v9 = vmul.f32 %v2968_v6, %v2807_v31  ;;  %v3016_v3 = vld [vmem:[%s4915_s18 + $0x10] sm:$0xff]  ;;  %v3018_v6 = vld [vmem:[%s4915_s18 + $0x20] sm:$0xff] }
 0x961   :  { %v2851_v57 = vadd.f32 %v2850_v46, %v2844_v45  ;;  %v2821_v33 = vadd.f32 %v2820_v47, %v2814_v51  ;;  %v2875_v58 = vadd.f32 %v2874_v48, %v2868_v52  ;;  %v2923_v32 = vadd.f32 %v2922_v50, %v2916_v54 }
 0x962   :  { %v2899_v60 = vadd.f32 %v2898_v55, %v2892_v41  ;;  %v2947_v61 = vadd.f32 %v2946_v56, %v2940_v59 }
 0x963   :  { %v3214_v49 = vmul.f32 -1.442695, %v2851_v57  ;;  %v3211_v62 = vmul.f32 -1.442695, %v2821_v33  ;;  %v3216_v0 = vmul.f32 -1.442695, %v2875_v58 }
 0x964   :  { %v3753_v1 = vpop.f32.mrb[40].mxu0  ;;  %v3220_v2 = vmul.f32 -1.442695, %v2923_v32  ;;  %v3218_v53 = vmul.f32 -1.442695, %v2899_v60 }
 0x965   :  { %2733 = vst.msk [vmem:[#allocation6 + $0x38] sm:$0xff] %vm97_vm0, %v3753_v1  ;;  %v2717_v63 = vpop.f32.mrb[41].mxu0  ;;  %4072 = vpow2.f32 %v3214_v49  ;;  %v3222_v12 = vmul.f32 -1.442695, %v2947_v61 }
 0x966   :  { %2732 = vst.msk [vmem:[#allocation6 + $0x30] sm:$0xff] %vm97_vm0, %v2717_v63  ;;  %4074 = vpow2.f32 %v3211_v62  ;;  %v3014_v63 = vld [vmem:[%s4915_s18] sm:$0xff] }
 0x967   :  { %4076 = vpow2.f32 %v3216_v0 }
 0x968   :  { %4078 = vpow2.f32 %v3220_v2 }
 0x969   :  { %4080 = vpow2.f32 %v3218_v53  ;;  %v3015_v53 = vld [vmem:[%s4915_s18 + $0x8] sm:$0xff] }
 0x96a   :  { %4082 = vpow2.f32 %v3222_v12  ;;  %v3967_v12 = vpack.c.bf16 %v3015_v53, %v3014_v63 }
 0x96c   :  { %v2988_v5 = vld [vmem:[#allocation6 + $0x38] sm:$0xff]  ;;  %3968 = vmatpush3.bf16.msra.mxu0 %v3967_v12 }
 0x96d   :  { %v2964_v7 = vld [vmem:[#allocation6 + $0x30] sm:$0xff]  ;;  %v2995_v8 = vadd.f32 %v2994_v4, %v2988_v5  ;;  %3969 = vmatprep.subr.bf16.mxu0 %v4179_v35  ;;  %v3017_v4 = vld [vmem:[%s4915_s18 + $0x18] sm:$0xff] }
 0x96e   :  { %v2971_v15 = vadd.f32 %v2970_v9, %v2964_v7  ;;  %v3970_v5 = vpack.c.bf16 %v3017_v4, %v3016_v3  ;;  %v3019_v7 = vld [vmem:[%s4915_s18 + $0x28] sm:$0xff]  ;;  %v3020_v9 = vld [vmem:[%s4915_s18 + $0x30] sm:$0xff] }
 0x96f   :  { %v4073_v10 = vpop.eup %4072  ;;  %v3226_v11 = vmul.f32 -1.442695, %v2995_v8  ;;  %v3973_v8 = vpack.c.bf16 %v3019_v7, %v3018_v6 }
 0x970   :  { %v4075_v13 = vpop.eup %4074  ;;  %v2855_v14 = vadd.f32 1.0, %v4073_v10  ;;  %v3224_v26 = vmul.f32 -1.442695, %v2971_v15  ;;  %3971 = vmatpush3.bf16.msra.mxu0 %v3970_v5  ;;  %v3021_v10 = vld [vmem:[%s4915_s18 + $0x38] sm:$0xff]  ;;  %s4182_s18 = smov [#allocation10]  }
 0x971   :  { %v4077_v16 = vpop.eup %4076  ;;  %v2825_v17 = vadd.f32 1.0, %v4075_v13  ;;  %4084 = vpow2.f32 %v3226_v11  ;;  %3972 = vmatprep.subr.bf16.mxu0 %v4179_v35  ;;  %v3976_v11 = vpack.c.bf16 %v3021_v10, %v3020_v9  ;;  %s3104_s26 = sshll.u32 %s4182_s18, 4  ;;  %s3105_s26 = int_to_ptr.vmem [resolvable:$true] %s3104_s26 }
 0x972   :  { %v4079_v18 = vpop.eup %4078  ;;  %4086 = vrcp.f32 %v2855_v14  ;;  %v2879_v19 = vadd.f32 1.0, %v4077_v16  ;;  %s4126_s15 = scalar_lea.vmem %s3105_s26, 128  ;;  %p4131_p9 = scmp.lt.s32.totalorder %s3105_s26, %s3105_s26 }
 0x973   :  { %v4081_v20 = vpop.eup %4080  ;;  %4088 = vrcp.f32 %v2825_v17  ;;  %v2927_v22 = vadd.f32 1.0, %v4079_v18  ;;  %p4127_p8 = scmp.ne.s32.totalorder %s3105_s26, %s4126_s15  ;;  %p4132_p10 = scmp.lt.s32.totalorder %s4126_s15, %s4126_s15 }
 0x974   :  { %v4083_v23 = vpop.eup %4082  ;;  %4090 = vrcp.f32 %v2879_v19  ;;  %v2903_v24 = vadd.f32 1.0, %v4081_v20  ;;  %3974 = vmatpush3.bf16.msra.mxu0 %v3973_v8 }
 0x975   :  { %4092 = vrcp.f32 %v2927_v22  ;;  %v2951_v27 = vadd.f32 1.0, %v4083_v23  ;;  %3975 = vmatprep.subr.bf16.mxu0 %v4179_v35  ;;  %p4133_p11 = por %p4132_p10, %p4131_p9 }
 0x976   :  { %4094 = vrcp.f32 %v2903_v24 }
 0x977   :  { %4096 = vpow2.f32 %v3224_v26  ;;  %p4134_p12 = pnand %p4133_p11, %p4127_p8 }
 0x978   :  { %4098 = vrcp.f32 %v2951_v27  ;;  %3977 = vmatpush3.bf16.msra.mxu0 %v3976_v11 }
 0x97b   :  { %v4085_v29 = vpop.eup %4084 }
 0x97c   :  { %v4087_v30 = vpop.eup %4086  ;;  %v2999_v31 = vadd.f32 1.0, %v4085_v29 }
 0x97d   :  { %v4089_v34 = vpop.eup %4088  ;;  %v2858_v36 = vmul.f32 %v4087_v30, %v3212_v28 }
 0x97e   :  { %v4091_v45 = vpop.eup %4090  ;;  %v2834_v46 = vmul.f32 %v4089_v34, %v3212_v28  ;;  %4100 = vrcp.f32 %v2999_v31 }
 0x97f   :  { %v4093_v47 = vpop.eup %4092  ;;  %v2859_v48 = vsel %vm97_vm0, %v2858_v36, 0.0  ;;  %v2882_v51 = vmul.f32 %v4091_v45, %v3212_v28 }
 0x980   :  { %2860 = vadd.xlane.f32.xlu1 %v2859_v48  ;;  %v2835_v50 = vsel %vm97_vm0, %v2834_v46, 0.0  ;;  %v2930_v52 = vmul.f32 %v4093_v47, %v3212_v28  ;;  %v4095_v54 = vpop.eup %4094 }
 0x981   :  { %2836 = vadd.xlane.f32.xlu0 %v2835_v50  ;;  %v4097_v55 = vpop.eup %4096  ;;  %v2883_v33 = vsel %vm97_vm0, %v2882_v51, 0.0  ;;  %v2906_v58 = vmul.f32 %v4095_v54, %v3212_v28 }
 0x982   :  { %v2931_v56 = vsel %vm97_vm0, %v2930_v52, 0.0  ;;  %v2975_v57 = vadd.f32 1.0, %v4097_v55  ;;  %v4099_v32 = vpop.eup %4098 }
 0x983   :  { %v2907_v41 = vsel %vm97_vm0, %v2906_v58, 0.0  ;;  %v2954_v59 = vmul.f32 %v4099_v32, %v3212_v28 }
 0x984   :  { %2932 = vadd.xlane.f32.xlu1 %v2931_v56  ;;  %4102 = vrcp.f32 %v2975_v57 }
 0x985   :  { %2884 = vadd.xlane.f32.xlu0 %v2883_v33  ;;  %v2955_v61 = vsel %vm97_vm0, %v2954_v59, 0.0 }
 0x988   :  { %v4101_v60 = vpop.eup %4100 }
 0x989   :  { %2908 = vadd.xlane.f32.xlu0 %v2907_v41  ;;  %v3002_v49 = vmul.f32 %v4101_v60, %v3212_v28 }
 0x98b   :  { %v3003_v1 = vsel %vm97_vm0, %v3002_v49, 0.0 }
 0x98d   :  { %2956 = vadd.xlane.f32.xlu0 %v2955_v61 }
 0x98e   :  { %v4103_v62 = vpop.eup %4102 }
 0x98f   :  { %v2978_v0 = vmul.f32 %v4103_v62, %v3212_v28 }
 0x991   :  { %3004 = vadd.xlane.f32.xlu0 %v3003_v1  ;;  %v2979_v2 = vsel %vm97_vm0, %v2978_v0, 0.0 }
 0x992   :  { %2980 = vadd.xlane.f32.xlu1 %v2979_v2 }
 0x9a3   :  { %3008 = vrot.lane.b32.xlu1 %v4813_v21, %s4181_s3 }
 0xa0d   :  { %v2861_v13 = vpop.xlane.xlu1 %2860 }
 0xa0e   :  { %v2837_v14 = vpop.xlane.xlu0 %2836  ;;  %v2862_v15 = vmul.f32 %v2861_v13, %v4760_v38 }
 0xa0f   :  { %v2838_v16 = vmul.f32 %v2837_v14, %v4750_v37 }
 0xa11   :  { %v2863_v18 = vadd.f32 %v2862_v15, %v2838_v16  ;;  %v2933_v19 = vpop.xlane.xlu1 %2932 }
 0xa12   :  { %v2885_v35 = vpop.xlane.xlu0 %2884  ;;  %v2934_v24 = vmul.f32 %v2933_v19, %v4776_v40 }
 0xa13   :  { %v2886_v17 = vmul.f32 %v2885_v35, %v4766_v39 }
 0xa15   :  { %v2887_v22 = vadd.f32 %v2886_v17, %v2863_v18 }
 0xa16   :  { %v2909_v20 = vpop.xlane.xlu0 %2908 }
 0xa17   :  { %v2910_v23 = vmul.f32 %v2909_v20, %v4772_v42 }
 0xa19   :  { %v2911_v21 = vadd.f32 %v2910_v23, %v2887_v22 }
 0xa1a   :  { %v2957_v26 = vpop.xlane.xlu0 %2956 }
 0xa1b   :  { %v2935_v27 = vadd.f32 %v2934_v24, %v2911_v21  ;;  %v2958_v28 = vmul.f32 %v2957_v26, %v4780_v43 }
 0xa1d   :  { %v2959_v38 = vadd.f32 %v2958_v28, %v2935_v27 }
 0xa1e   :  { %v3005_v29 = vpop.xlane.xlu0 %3004 }
 0xa1f   :  { %v2981_v30 = vpop.xlane.xlu1 %2980  ;;  %v3006_v39 = vmul.f32 %v3005_v29, %v4817_v25 }
 0xa20   :  { %v2982_v37 = vmul.f32 %v2981_v30, %v4784_v44 }
 0xa22   :  { %v2983_v31 = vadd.f32 %v2982_v37, %v2959_v38 }
 0xa23   :  { %v3009_v36 = vpop.permute.xlu1 %3008 }
 0xa24   :  { %v3007_v34 = vadd.f32 %v3006_v39, %v2983_v31 }
 0xa26   :  { %v3011_v42 = vsel %vm97_vm0, %v3007_v34, %v3009_v36 }
 0xa27   :  { %3782 = vmatmul.mubr.msk.f32.vlgmr.msra.gmra.mrb[42].mxu0 %vm3012_vm10, %v3011_v42  ;;  %3013 = vst.msk [vmem:[#allocation10] sm:$0xff] %vm3012_vm10, %v3011_v42 }
 0xa28   :  { %4137 = shalt.err (!%p4134_p12)
}
 0xa29   :  { %s4138_s9 = scalar_lea.hbm %s4916_s19, 128 }
 0xa2a   :  { %p4139_p13 = scmp.ne.s32.totalorder %s4916_s19, %s4138_s9  ;;  %p4142_p0 = scmp.lt.u32.totalorder %s4138_s9, %s4916_s19 }
 0xa2c   :  { %p4144_p1 = pnand %p4142_p0, %p4139_p13 }
 0xa2e   :  { %4147 = shalt.err (!%p4144_p1)
}
 0xa2f   :  { %3107 = dma.vmem_to_hbm [thread:$0]  %s3105_s26, 128, %s4916_s19, [#allocation9]   ;;  %vm3096_vm11 = vcmask 257024  }
 0xa30   :  { %s4183_s17 = smov [#allocation11]  }
 0xa31   :  { %s3114_s1 = sshll.u32 %s4183_s17, 4  ;;  %s3115_s1 = int_to_ptr.vmem [resolvable:$true] %s3114_s1 }
 0xa32   :  { %s4148_s23 = scalar_lea.vmem %s3115_s1, 64  ;;  %p4153_p3 = scmp.lt.s32.totalorder %s3115_s1, %s3115_s1 }
 0xa33   :  { %p4149_p2 = scmp.ne.s32.totalorder %s3115_s1, %s4148_s23  ;;  %p4154_p4 = scmp.lt.s32.totalorder %s4148_s23, %s4148_s23 }
 0xa35   :  { %p4155_p5 = por %p4154_p4, %p4153_p3 }
 0xa37   :  { %p4156_p6 = pnand %p4155_p5, %p4149_p2 }
 0xafa   :  { %v3091_v40 = vpop.f32.mrb[42].mxu0 }
 0xafb   :  { %v3095_v43 = vpack.c.bf16 %v3091_v40, %v3091_v40  ;;  %v3783_v44 = vpop.f32.mrb[43].mxu0 }
 0xafd   :  { %3097 = vst.msk [vmem:[#allocation11] sm:$0xf] %vm3096_vm11, %v3095_v43 }
 0xafe   :  { %4159 = shalt.err (!%p4156_p6)
}
 0xaff   :  { %s4160_s8 = scalar_lea.hbm %s4917_s20, 64 }
 0xb00   :  { %p4161_p7 = scmp.ne.s32.totalorder %s4917_s20, %s4160_s8  ;;  %p4164_p8 = scmp.lt.u32.totalorder %s4160_s8, %s4917_s20 }
 0xb02   :  { %p4166_p9 = pnand %p4164_p8, %p4161_p7 }
 0xb04   :  { %4169 = shalt.err (!%p4166_p9)
}
 0xb05   :  { %3117 = dma.vmem_to_hbm [thread:$0]  %s3115_s1, 64, %s4917_s20, [#allocation12]  }
 0xb06   :  { %4172 = dma.done.wait [#allocation9], 128  }
 0xb07   :  { %4173 = vsyncadd [#allocation9], 4294967168 }
 0xb08   :  { %4174 = dma.done.wait [#allocation12], 64  }
 0xb09   :  { %4175 = vsyncadd [#allocation12], 4294967232 }
 0xb0a   :  { %3124 = vsyncpa [#allocation8], 1 }
 0xb0b   :  { %3125 = vsyncpa [#allocation9], 1 }
 0xb0c   :  { %3126 = vsyncpa [#allocation12], 1 }

</bundles_post_ra>
